<compile_context>
chip_gen: v7x
topology: tpu7x:2x2x1
jax: 0.10.0
libtpu: 0.0.40
codegen_flags: <defaults>
</compile_context>

<pallas_src>
import functools

import jax
import jax.numpy as jnp
from jax.experimental import pallas as pl
from jax.experimental.pallas import tpu as pltpu


def _make_decoder_kernel(C, Npad, Wp, need1x1_up, alpha, mxu_dtype):
    # flat-index offset of each 3x3 tap inside the zero-padded (Hp, Wp) image
    taps = [(ky - 1) * Wp + (kx - 1) for ky in range(3) for kx in range(3)]

    def kernel(*refs):
        if need1x1_up:
            (x_ref, mask_ref, s1_ref, t1_ref,
             w1_ref, sc1_ref, sh1_ref,
             w2_ref, sc2_ref, sh2_ref,
             w3_ref, sc3_ref, sh3_ref,
             o_ref, act_s, p_s) = refs
        else:
            (x_ref, mask_ref, s1_ref, t1_ref,
             w1_ref, sc1_ref, sh1_ref,
             w2_ref, sc2_ref, sh2_ref,
             o_ref, act_s, p_s) = refs

        mask = mask_ref[...]                                    # (1, Npad)

        def build_taps():
            # Roll-based im2col: 9 full-width, lane-aligned row-block stores.
            # pltpu.roll runs on the XLU; stores are unmasked full rows.
            # Wrapped columns only ever feed pad-ring / lane-tail output
            # columns, which are masked (stage 1) or stripped (wrapper), and
            # act_s is always fully written with finite values.
            for t, d in enumerate(taps):
                rolled = pltpu.roll(act_s[...], shift=(-d) % Npad, axis=1)
                p_s[t * C:(t + 1) * C, :] = rolled.astype(mxu_dtype)

        def conv_bn_act(w_ref, sc_ref, sh_ref):
            # One big-K (=9*C) bf16 MXU matmul with f32 accumulation; fused
            # conv-bias + BatchNorm + LeakyReLU epilogue in f32.
            y = jnp.dot(w_ref[...], p_s[...],
                        preferred_element_type=jnp.float32)     # (C, Npad)
            y = y * sc_ref[...] + sh_ref[...]
            return jnp.where(y >= 0.0, y, alpha * y)

        # stage 0: BN1 on the (wrapper zero-padded) input; the mask keeps the
        # 1-px ring and the lane tail exactly zero.  One lane-dense store.
        act_s[...] = (x_ref[...] * s1_ref[...] + t1_ref[...]) * mask

        # stage 1: conv3x3 -> BN -> LeakyReLU, re-masked so the ring stays 0
        # and acts as conv2's zero padding.  The result overwrites act_s (its
        # source was already consumed into p_s), keeping VMEM use minimal.
        build_taps()
        act_s[...] = conv_bn_act(w1_ref, sc1_ref, sh1_ref) * mask

        # stage 2: conv3x3 -> BN -> LeakyReLU
        build_taps()
        h = conv_bn_act(w2_ref, sc2_ref, sh2_ref)

        # stage 3 (optional): conv1x1 -> BN -> LeakyReLU.  Park the RHS in the
        # (bf16) tap scratch so the (C, Npad) activation does not have to stay
        # vreg-resident across the matmul.
        if need1x1_up:
            p_s[0:C, :] = h.astype(mxu_dtype)
            y3 = jnp.dot(w3_ref[...], p_s[0:C, :],
                         preferred_element_type=jnp.float32)
            y3 = y3 * sc3_ref[...] + sh3_ref[...]
            h = jnp.where(y3 >= 0.0, y3, alpha * y3)

        # padded, lane-dense output; the wrapper strips ring + lane tail.
        o_ref[...] = h.astype(o_ref.dtype)

    return kernel


def _bn_fold(gamma, beta, mean, var, eps):
    s = gamma / jnp.sqrt(var + eps)
    return s, beta - mean * s


def decoder_block_apply(x, params, *, need1x1_up=True, alpha=0.2, eps=1e-5,
                        mxu_dtype=jnp.bfloat16):
    """Eval-mode DecoderBlock forward. x: (B, C, H, W) NCHW, returns NCHW."""
    B, Cin, H, W = x.shape
    Cout = params["conv1_w"].shape[0]
    # The module's first bn(num_features=out_channel) is applied to the block
    # input, so in_channel == out_channel (as in the PyTorch code).
    assert Cin == Cout, "DecoderBlock requires in_channel == out_channel"
    C = Cout
    Hp, Wp = H + 2, W + 2
    N = Hp * Wp
    Npad = ((N + 127) // 128) * 128          # lane-dense width (128 multiple)

    # --- fold BN to per-channel scale/shift; fuse each conv bias into the
    #     following BN's shift (tiny host-side math, no extra HBM passes).
    s1, t1 = _bn_fold(params["bn1_g"], params["bn1_b"],
                      params["bn1_m"], params["bn1_v"], eps)
    s2, t2 = _bn_fold(params["bn2_g"], params["bn2_b"],
                      params["bn2_m"], params["bn2_v"], eps)
    s3, t3 = _bn_fold(params["bn3_g"], params["bn3_b"],
                      params["bn3_m"], params["bn3_v"], eps)
    s1 = s1.reshape(C, 1).astype(jnp.float32)
    t1 = t1.reshape(C, 1).astype(jnp.float32)
    sc1 = s2.reshape(C, 1).astype(jnp.float32)
    sh1 = (t2 + params["conv1_b"] * s2).reshape(C, 1).astype(jnp.float32)
    sc2 = s3.reshape(C, 1).astype(jnp.float32)
    sh2 = (t3 + params["conv2_b"] * s3).reshape(C, 1).astype(jnp.float32)

    # conv weights -> (C, 9*C) bf16; column index = (ky*3+kx)*C + c, matching
    # the in-kernel tap-row ordering.
    w1m = jnp.transpose(params["conv1_w"], (0, 2, 3, 1)).reshape(C, 9 * C)
    w2m = jnp.transpose(params["conv2_w"], (0, 2, 3, 1)).reshape(C, 9 * C)
    w1m = w1m.astype(mxu_dtype)
    w2m = w2m.astype(mxu_dtype)

    # zero-pad once in the wrapper (1-px ring + lane tail); removes the
    # per-row masked scatter/gather from the kernel.
    xp = jnp.pad(x.astype(jnp.float32), ((0, 0), (0, 0), (1, 1), (1, 1)))
    xp = jnp.pad(xp.reshape(B, C, N), ((0, 0), (0, 0), (0, Npad - N)))

    # interior mask of the padded, lane-padded flat image (fetched once).
    mask = jnp.zeros((Hp, Wp), jnp.float32).at[1:H + 1, 1:W + 1].set(1.0)
    mask = jnp.pad(mask.reshape(1, N), ((0, 0), (0, Npad - N)))

    inputs = [xp, mask, s1, t1, w1m, sc1, sh1, w2m, sc2, sh2]
    in_specs = [pl.BlockSpec((None, C, Npad), lambda b: (b, 0, 0))]
    in_specs += [pl.BlockSpec(a.shape, lambda b: (0, 0)) for a in inputs[1:]]

    if need1x1_up:
        s4, t4 = _bn_fold(params["bn4_g"], params["bn4_b"],
                          params["bn4_m"], params["bn4_v"], eps)
        w3m = params["conv3_w"].reshape(C, C).astype(mxu_dtype)
        sc3 = s4.reshape(C, 1).astype(jnp.float32)
        sh3 = (t4 + params["conv3_b"] * s4).reshape(C, 1).astype(jnp.float32)
        extra = [w3m, sc3, sh3]
        inputs += extra
        in_specs += [pl.BlockSpec(a.shape, lambda b: (0, 0)) for a in extra]

    kernel = _make_decoder_kernel(C, Npad, Wp, need1x1_up, alpha, mxu_dtype)

    # cost hint so XLA schedules the surrounding graph around the fused call.
    flops = B * Npad * (2 * 2 * (9 * C) * C + (2 * C * C if need1x1_up else 0))
    bytes_accessed = (B * C * Npad * 4 * 2
                      + (2 * 9 * C * C + (C * C if need1x1_up else 0)) * 2)
    # scoped-VMEM sizing: scratch + double-buffered I/O blocks, with headroom;
    # above the 16/32 MiB defaults, within every generation's physical VMEM.
    itemsize = jnp.dtype(mxu_dtype).itemsize
    need_vmem = (C * Npad * 4 + 9 * C * Npad * itemsize + 4 * C * Npad * 4)
    vmem_limit = int(min(max(2 * need_vmem + (4 << 20), 32 << 20), 64 << 20))

    out_pad = pl.pallas_call(
        kernel,
        out_shape=jax.ShapeDtypeStruct((B, C, Npad), jnp.float32),
        grid=(B,),
        in_specs=in_specs,
        out_specs=pl.BlockSpec((None, C, Npad), lambda b: (b, 0, 0)),
        scratch_shapes=[
            pltpu.VMEM((C, Npad), jnp.float32),      # padded activation slab
            pltpu.VMEM((9 * C, Npad), mxu_dtype),    # rolled-tap im2col (bf16)
        ],
        compiler_params=pltpu.CompilerParams(
            dimension_semantics=("parallel",),
            vmem_limit_bytes=vmem_limit),
        cost_estimate=pl.CostEstimate(flops=flops, transcendentals=0,
                                      bytes_accessed=bytes_accessed),
    )(*inputs)

    # strip lane tail + 1-px ring with one XLA slice (tiny mem-bound op).
    out = out_pad[:, :, :N].reshape(B, C, Hp, Wp)[:, :, 1:H + 1, 1:W + 1]
    return out.astype(x.dtype)


# ----------------------------- pure-JAX reference ----------------------------
def _bn_ref(z, g, b, m, v, eps):
    inv = g / jnp.sqrt(v + eps)
    return (z - m[None, :, None, None]) * inv[None, :, None, None] \
        + b[None, :, None, None]


def _conv_ref(z, w, b, pad):
    out = jax.lax.conv_general_dilated(
        z, w, window_strides=(1, 1), padding=((pad, pad), (pad, pad)),
        dimension_numbers=("NCHW", "OIHW", "NCHW"))
    return out + b[None, :, None, None]


def decoder_block_ref(x, p, *, need1x1_up, alpha, eps):
    lrelu = lambda z: jnp.where(z >= 0, z, alpha * z)
    h = _bn_ref(x, p["bn1_g"], p["bn1_b"], p["bn1_m"], p["bn1_v"], eps)
    h = _conv_ref(h, p["conv1_w"], p["conv1_b"], 1)
    h = lrelu(_bn_ref(h, p["bn2_g"], p["bn2_b"], p["bn2_m"], p["bn2_v"], eps))
    h = _conv_ref(h, p["conv2_w"], p["conv2_b"], 1)
    h = lrelu(_bn_ref(h, p["bn3_g"], p["bn3_b"], p["bn3_m"], p["bn3_v"], eps))
    if need1x1_up:
        h = _conv_ref(h, p["conv3_w"], p["conv3_b"], 0)
        h = lrelu(_bn_ref(h, p["bn4_g"], p["bn4_b"], p["bn4_m"], p["bn4_v"], eps))
    return h


if __name__ == "__main__":
    # in_channel == out_channel (required by the module's first bn(out_channel));
    # C is a multiple of 16 so the bf16 tap row-blocks are tile-aligned.
    B, C, H, W = 2, 16, 16, 16
    need1x1_up = True
    alpha, eps = 0.2, 1e-5

    keys = iter(jax.random.split(jax.random.PRNGKey(0), 16))
    x = jax.random.normal(next(keys), (B, C, H, W), dtype=jnp.float32)

    def conv_init(k, cout, cin, ksz):
        fan_in = cin * ksz * ksz
        bound = 1.0 / (fan_in ** 0.5)
        kw, kb = jax.random.split(k)
        w = jax.random.uniform(kw, (cout, cin, ksz, ksz), jnp.float32,
                               -bound, bound)
        b = jax.random.uniform(kb, (cout,), jnp.float32, -bound, bound)
        return w, b

    def bn_init(k, c):
        k1, k2, k3, k4 = jax.random.split(k, 4)
        g = jax.random.uniform(k1, (c,), jnp.float32, 0.5, 1.5)
        b = 0.1 * jax.random.normal(k2, (c,), jnp.float32)
        m = 0.1 * jax.random.normal(k3, (c,), jnp.float32)
        v = jax.random.uniform(k4, (c,), jnp.float32, 0.5, 1.5)
        return g, b, m, v

    p = {}
    p["bn1_g"], p["bn1_b"], p["bn1_m"], p["bn1_v"] = bn_init(next(keys), C)
    p["conv1_w"], p["conv1_b"] = conv_init(next(keys), C, C, 3)
    p["bn2_g"], p["bn2_b"], p["bn2_m"], p["bn2_v"] = bn_init(next(keys), C)
    p["conv2_w"], p["conv2_b"] = conv_init(next(keys), C, C, 3)
    p["bn3_g"], p["bn3_b"], p["bn3_m"], p["bn3_v"] = bn_init(next(keys), C)
    p["conv3_w"], p["conv3_b"] = conv_init(next(keys), C, C, 1)
    p["bn4_g"], p["bn4_b"], p["bn4_m"], p["bn4_v"] = bn_init(next(keys), C)

    fwd = jax.jit(functools.partial(decoder_block_apply,
                                    need1x1_up=need1x1_up,
                                    alpha=alpha, eps=eps))
    out = jax.block_until_ready(fwd(x, p))
    assert out.shape == (B, C, H, W), out.shape

    ref = decoder_block_ref(x, p, need1x1_up=need1x1_up, alpha=alpha, eps=eps)
    max_err = float(jnp.max(jnp.abs(out - ref)))
    # bf16 MXU path (f32 accumulation) vs f32 reference: relaxed tolerance.
    assert jnp.allclose(out, ref, atol=5e-2, rtol=5e-2), max_err
    print("KERNEL_OK")
</pallas_src>

<mosaic_0001>
module attributes {stable_mosaic.version = 11 : i64} {
  func.func @kernel(%arg0: i32, %arg1: memref<1x16x384xf32, #tpu.memory_space<vmem>>, %arg2: memref<1x384xf32, #tpu.memory_space<vmem>>, %arg3: memref<16x1xf32, #tpu.memory_space<vmem>>, %arg4: memref<16x1xf32, #tpu.memory_space<vmem>>, %arg5: memref<16x144xbf16, #tpu.memory_space<vmem>>, %arg6: memref<16x1xf32, #tpu.memory_space<vmem>>, %arg7: memref<16x1xf32, #tpu.memory_space<vmem>>, %arg8: memref<16x144xbf16, #tpu.memory_space<vmem>>, %arg9: memref<16x1xf32, #tpu.memory_space<vmem>>, %arg10: memref<16x1xf32, #tpu.memory_space<vmem>>, %arg11: memref<16x16xbf16, #tpu.memory_space<vmem>>, %arg12: memref<16x1xf32, #tpu.memory_space<vmem>>, %arg13: memref<16x1xf32, #tpu.memory_space<vmem>>, %arg14: memref<1x16x384xf32, #tpu.memory_space<vmem>>, %arg15: memref<16x384xf32, #tpu.memory_space<vmem>>, %arg16: memref<144x384xbf16, #tpu.memory_space<vmem>>) attributes {dimension_semantics = [#tpu.dimension_semantics<parallel>], iteration_bounds = array<i64: 2>, scalar_prefetch = 0 : i64, scratch_operands = 2 : i64, tpu.core_type = #tpu.core_type<tc>, window_params = [{transform_indices = @transform_0, window_bounds = array<i64: 1, 16, 384>}, {pipeline_mode = #tpu.pipeline_mode<synchronous>, transform_indices = @transform_1, window_bounds = array<i64: 1, 384>}, {pipeline_mode = #tpu.pipeline_mode<synchronous>, transform_indices = @transform_2, window_bounds = array<i64: 16, 1>}, {pipeline_mode = #tpu.pipeline_mode<synchronous>, transform_indices = @transform_3, window_bounds = array<i64: 16, 1>}, {pipeline_mode = #tpu.pipeline_mode<synchronous>, transform_indices = @transform_4, window_bounds = array<i64: 16, 144>}, {pipeline_mode = #tpu.pipeline_mode<synchronous>, transform_indices = @transform_5, window_bounds = array<i64: 16, 1>}, {pipeline_mode = #tpu.pipeline_mode<synchronous>, transform_indices = @transform_6, window_bounds = array<i64: 16, 1>}, {pipeline_mode = #tpu.pipeline_mode<synchronous>, transform_indices = @transform_7, window_bounds = array<i64: 16, 144>}, {pipeline_mode = #tpu.pipeline_mode<synchronous>, transform_indices = @transform_8, window_bounds = array<i64: 16, 1>}, {pipeline_mode = #tpu.pipeline_mode<synchronous>, transform_indices = @transform_9, window_bounds = array<i64: 16, 1>}, {pipeline_mode = #tpu.pipeline_mode<synchronous>, transform_indices = @transform_10, window_bounds = array<i64: 16, 16>}, {pipeline_mode = #tpu.pipeline_mode<synchronous>, transform_indices = @transform_11, window_bounds = array<i64: 16, 1>}, {pipeline_mode = #tpu.pipeline_mode<synchronous>, transform_indices = @transform_12, window_bounds = array<i64: 16, 1>}, {transform_indices = @transform_13, window_bounds = array<i64: 1, 16, 384>}]} {
    %c0 = arith.constant 0 : index
    %c0_0 = arith.constant 0 : index
    %0 = vector.load %arg2[%c0, %c0_0] : memref<1x384xf32, #tpu.memory_space<vmem>>, vector<1x384xf32>
    %c0_1 = arith.constant 0 : index
    %c0_2 = arith.constant 0 : index
    %c0_3 = arith.constant 0 : index
    %1 = vector.load %arg1[%c0_1, %c0_2, %c0_3] : memref<1x16x384xf32, #tpu.memory_space<vmem>>, vector<1x16x384xf32>
    %2 = vector.shape_cast %1 : vector<1x16x384xf32> to vector<16x384xf32>
    %c0_4 = arith.constant 0 : index
    %c0_5 = arith.constant 0 : index
    %3 = vector.load %arg3[%c0_4, %c0_5] : memref<16x1xf32, #tpu.memory_space<vmem>>, vector<16x1xf32>
    %4 = vector.broadcast %3 : vector<16x1xf32> to vector<16x384xf32>
    %5 = arith.mulf %2, %4 : vector<16x384xf32>
    %c0_6 = arith.constant 0 : index
    %c0_7 = arith.constant 0 : index
    %6 = vector.load %arg4[%c0_6, %c0_7] : memref<16x1xf32, #tpu.memory_space<vmem>>, vector<16x1xf32>
    %7 = vector.broadcast %6 : vector<16x1xf32> to vector<16x384xf32>
    %8 = arith.addf %5, %7 : vector<16x384xf32>
    %9 = vector.broadcast %0 : vector<1x384xf32> to vector<16x384xf32>
    %10 = arith.mulf %8, %9 : vector<16x384xf32>
    %c0_8 = arith.constant 0 : index
    %c0_9 = arith.constant 0 : index
    %11 = vector.load %arg15[%c0_8, %c0_9] : memref<16x384xf32, #tpu.memory_space<vmem>>, vector<16x384xf32>
    tpu.vector_store %arg15[%c0_8, %c0_9], %10 {strides = array<i32>} : memref<16x384xf32, #tpu.memory_space<vmem>>, vector<16x384xf32>,
    %c0_10 = arith.constant 0 : index
    %c0_11 = arith.constant 0 : index
    %12 = vector.load %arg15[%c0_10, %c0_11] : memref<16x384xf32, #tpu.memory_space<vmem>>, vector<16x384xf32>
    %c19_i32 = arith.constant 19 : i32
    %13 = tpu.dynamic_rotate %12 by %c19_i32 dim 1 : vector<16x384xf32>, i32 -> vector<16x384xf32>
    %14 = arith.truncf %13 : vector<16x384xf32> to vector<16x384xbf16>
    %c0_12 = arith.constant 0 : index
    %c0_13 = arith.constant 0 : index
    %15 = vector.load %arg16[%c0_12, %c0_13] : memref<144x384xbf16, #tpu.memory_space<vmem>>, vector<16x384xbf16>
    tpu.vector_store %arg16[%c0_12, %c0_13], %14 {strides = array<i32>} : memref<144x384xbf16, #tpu.memory_space<vmem>>, vector<16x384xbf16>,
    %c0_14 = arith.constant 0 : index
    %c0_15 = arith.constant 0 : index
    %16 = vector.load %arg15[%c0_14, %c0_15] : memref<16x384xf32, #tpu.memory_space<vmem>>, vector<16x384xf32>
    %c18_i32 = arith.constant 18 : i32
    %17 = tpu.dynamic_rotate %16 by %c18_i32 dim 1 : vector<16x384xf32>, i32 -> vector<16x384xf32>
    %18 = arith.truncf %17 : vector<16x384xf32> to vector<16x384xbf16>
    %c16 = arith.constant 16 : index
    %c0_16 = arith.constant 0 : index
    %19 = vector.load %arg16[%c16, %c0_16] : memref<144x384xbf16, #tpu.memory_space<vmem>>, vector<16x384xbf16>
    tpu.vector_store %arg16[%c16, %c0_16], %18 {strides = array<i32>} : memref<144x384xbf16, #tpu.memory_space<vmem>>, vector<16x384xbf16>,
    %c0_17 = arith.constant 0 : index
    %c0_18 = arith.constant 0 : index
    %20 = vector.load %arg15[%c0_17, %c0_18] : memref<16x384xf32, #tpu.memory_space<vmem>>, vector<16x384xf32>
    %c17_i32 = arith.constant 17 : i32
    %21 = tpu.dynamic_rotate %20 by %c17_i32 dim 1 : vector<16x384xf32>, i32 -> vector<16x384xf32>
    %22 = arith.truncf %21 : vector<16x384xf32> to vector<16x384xbf16>
    %c32 = arith.constant 32 : index
    %c0_19 = arith.constant 0 : index
    %23 = vector.load %arg16[%c32, %c0_19] : memref<144x384xbf16, #tpu.memory_space<vmem>>, vector<16x384xbf16>
    tpu.vector_store %arg16[%c32, %c0_19], %22 {strides = array<i32>} : memref<144x384xbf16, #tpu.memory_space<vmem>>, vector<16x384xbf16>,
    %c0_20 = arith.constant 0 : index
    %c0_21 = arith.constant 0 : index
    %24 = vector.load %arg15[%c0_20, %c0_21] : memref<16x384xf32, #tpu.memory_space<vmem>>, vector<16x384xf32>
    %c1_i32 = arith.constant 1 : i32
    %25 = tpu.dynamic_rotate %24 by %c1_i32 dim 1 : vector<16x384xf32>, i32 -> vector<16x384xf32>
    %26 = arith.truncf %25 : vector<16x384xf32> to vector<16x384xbf16>
    %c48 = arith.constant 48 : index
    %c0_22 = arith.constant 0 : index
    %27 = vector.load %arg16[%c48, %c0_22] : memref<144x384xbf16, #tpu.memory_space<vmem>>, vector<16x384xbf16>
    tpu.vector_store %arg16[%c48, %c0_22], %26 {strides = array<i32>} : memref<144x384xbf16, #tpu.memory_space<vmem>>, vector<16x384xbf16>,
    %c0_23 = arith.constant 0 : index
    %c0_24 = arith.constant 0 : index
    %28 = vector.load %arg15[%c0_23, %c0_24] : memref<16x384xf32, #tpu.memory_space<vmem>>, vector<16x384xf32>
    %c0_i32 = arith.constant 0 : i32
    %29 = tpu.dynamic_rotate %28 by %c0_i32 dim 1 : vector<16x384xf32>, i32 -> vector<16x384xf32>
    %30 = arith.truncf %29 : vector<16x384xf32> to vector<16x384xbf16>
    %c64 = arith.constant 64 : index
    %c0_25 = arith.constant 0 : index
    %31 = vector.load %arg16[%c64, %c0_25] : memref<144x384xbf16, #tpu.memory_space<vmem>>, vector<16x384xbf16>
    tpu.vector_store %arg16[%c64, %c0_25], %30 {strides = array<i32>} : memref<144x384xbf16, #tpu.memory_space<vmem>>, vector<16x384xbf16>,
    %c0_26 = arith.constant 0 : index
    %c0_27 = arith.constant 0 : index
    %32 = vector.load %arg15[%c0_26, %c0_27] : memref<16x384xf32, #tpu.memory_space<vmem>>, vector<16x384xf32>
    %c383_i32 = arith.constant 383 : i32
    %33 = tpu.dynamic_rotate %32 by %c383_i32 dim 1 : vector<16x384xf32>, i32 -> vector<16x384xf32>
    %34 = arith.truncf %33 : vector<16x384xf32> to vector<16x384xbf16>
    %c80 = arith.constant 80 : index
    %c0_28 = arith.constant 0 : index
    %35 = vector.load %arg16[%c80, %c0_28] : memref<144x384xbf16, #tpu.memory_space<vmem>>, vector<16x384xbf16>
    tpu.vector_store %arg16[%c80, %c0_28], %34 {strides = array<i32>} : memref<144x384xbf16, #tpu.memory_space<vmem>>, vector<16x384xbf16>,
    %c0_29 = arith.constant 0 : index
    %c0_30 = arith.constant 0 : index
    %36 = vector.load %arg15[%c0_29, %c0_30] : memref<16x384xf32, #tpu.memory_space<vmem>>, vector<16x384xf32>
    %c367_i32 = arith.constant 367 : i32
    %37 = tpu.dynamic_rotate %36 by %c367_i32 dim 1 : vector<16x384xf32>, i32 -> vector<16x384xf32>
    %38 = arith.truncf %37 : vector<16x384xf32> to vector<16x384xbf16>
    %c96 = arith.constant 96 : index
    %c0_31 = arith.constant 0 : index
    %39 = vector.load %arg16[%c96, %c0_31] : memref<144x384xbf16, #tpu.memory_space<vmem>>, vector<16x384xbf16>
    tpu.vector_store %arg16[%c96, %c0_31], %38 {strides = array<i32>} : memref<144x384xbf16, #tpu.memory_space<vmem>>, vector<16x384xbf16>,
    %c0_32 = arith.constant 0 : index
    %c0_33 = arith.constant 0 : index
    %40 = vector.load %arg15[%c0_32, %c0_33] : memref<16x384xf32, #tpu.memory_space<vmem>>, vector<16x384xf32>
    %c366_i32 = arith.constant 366 : i32
    %41 = tpu.dynamic_rotate %40 by %c366_i32 dim 1 : vector<16x384xf32>, i32 -> vector<16x384xf32>
    %42 = arith.truncf %41 : vector<16x384xf32> to vector<16x384xbf16>
    %c112 = arith.constant 112 : index
    %c0_34 = arith.constant 0 : index
    %43 = vector.load %arg16[%c112, %c0_34] : memref<144x384xbf16, #tpu.memory_space<vmem>>, vector<16x384xbf16>
    tpu.vector_store %arg16[%c112, %c0_34], %42 {strides = array<i32>} : memref<144x384xbf16, #tpu.memory_space<vmem>>, vector<16x384xbf16>,
    %c0_35 = arith.constant 0 : index
    %c0_36 = arith.constant 0 : index
    %44 = vector.load %arg15[%c0_35, %c0_36] : memref<16x384xf32, #tpu.memory_space<vmem>>, vector<16x384xf32>
    %c365_i32 = arith.constant 365 : i32
    %45 = tpu.dynamic_rotate %44 by %c365_i32 dim 1 : vector<16x384xf32>, i32 -> vector<16x384xf32>
    %46 = arith.truncf %45 : vector<16x384xf32> to vector<16x384xbf16>
    %c128 = arith.constant 128 : index
    %c0_37 = arith.constant 0 : index
    %47 = vector.load %arg16[%c128, %c0_37] : memref<144x384xbf16, #tpu.memory_space<vmem>>, vector<16x384xbf16>
    tpu.vector_store %arg16[%c128, %c0_37], %46 {strides = array<i32>} : memref<144x384xbf16, #tpu.memory_space<vmem>>, vector<16x384xbf16>,
    %c0_38 = arith.constant 0 : index
    %c0_39 = arith.constant 0 : index
    %48 = vector.load %arg5[%c0_38, %c0_39] : memref<16x144xbf16, #tpu.memory_space<vmem>>, vector<16x144xbf16>
    %c0_40 = arith.constant 0 : index
    %c0_41 = arith.constant 0 : index
    %49 = vector.load %arg16[%c0_40, %c0_41] : memref<144x384xbf16, #tpu.memory_space<vmem>>, vector<144x384xbf16>
    %cst = arith.constant dense<0.000000e+00> : vector<16x384xf32>
    %50 = tpu.matmul %48, %49, %cst {dimension_numbers = #tpu.dot_dimension_numbers<[1], [0], [0], [1], [0, 0, 1, 1], [], []>} : vector<16x144xbf16>, vector<144x384xbf16>, vector<16x384xf32> -> vector<16x384xf32>
    %c0_42 = arith.constant 0 : index
    %c0_43 = arith.constant 0 : index
    %51 = vector.load %arg6[%c0_42, %c0_43] : memref<16x1xf32, #tpu.memory_space<vmem>>, vector<16x1xf32>
    %52 = vector.broadcast %51 : vector<16x1xf32> to vector<16x384xf32>
    %53 = arith.mulf %50, %52 : vector<16x384xf32>
    %c0_44 = arith.constant 0 : index
    %c0_45 = arith.constant 0 : index
    %54 = vector.load %arg7[%c0_44, %c0_45] : memref<16x1xf32, #tpu.memory_space<vmem>>, vector<16x1xf32>
    %55 = vector.broadcast %54 : vector<16x1xf32> to vector<16x384xf32>
    %56 = arith.addf %53, %55 : vector<16x384xf32>
    %cst_46 = arith.constant 0.000000e+00 : f32
    %57 = vector.broadcast %cst_46 : f32 to vector<16x384xf32>
    %58 = arith.cmpf oge, %56, %57 : vector<16x384xf32>
    %cst_47 = arith.constant 2.000000e-01 : f32
    %59 = vector.broadcast %cst_47 : f32 to vector<16x384xf32>
    %60 = arith.mulf %59, %56 : vector<16x384xf32>
    %61 = arith.select %58, %56, %60 : vector<16x384xi1>, vector<16x384xf32>
    %62 = vector.broadcast %0 : vector<1x384xf32> to vector<16x384xf32>
    %63 = arith.mulf %61, %62 : vector<16x384xf32>
    %c0_48 = arith.constant 0 : index
    %c0_49 = arith.constant 0 : index
    %64 = vector.load %arg15[%c0_48, %c0_49] : memref<16x384xf32, #tpu.memory_space<vmem>>, vector<16x384xf32>
    tpu.vector_store %arg15[%c0_48, %c0_49], %63 {strides = array<i32>} : memref<16x384xf32, #tpu.memory_space<vmem>>, vector<16x384xf32>,
    %c0_50 = arith.constant 0 : index
    %c0_51 = arith.constant 0 : index
    %65 = vector.load %arg15[%c0_50, %c0_51] : memref<16x384xf32, #tpu.memory_space<vmem>>, vector<16x384xf32>
    %c19_i32_52 = arith.constant 19 : i32
    %66 = tpu.dynamic_rotate %65 by %c19_i32_52 dim 1 : vector<16x384xf32>, i32 -> vector<16x384xf32>
    %67 = arith.truncf %66 : vector<16x384xf32> to vector<16x384xbf16>
    %c0_53 = arith.constant 0 : index
    %c0_54 = arith.constant 0 : index
    %68 = vector.load %arg16[%c0_53, %c0_54] : memref<144x384xbf16, #tpu.memory_space<vmem>>, vector<16x384xbf16>
    tpu.vector_store %arg16[%c0_53, %c0_54], %67 {strides = array<i32>} : memref<144x384xbf16, #tpu.memory_space<vmem>>, vector<16x384xbf16>,
    %c0_55 = arith.constant 0 : index
    %c0_56 = arith.constant 0 : index
    %69 = vector.load %arg15[%c0_55, %c0_56] : memref<16x384xf32, #tpu.memory_space<vmem>>, vector<16x384xf32>
    %c18_i32_57 = arith.constant 18 : i32
    %70 = tpu.dynamic_rotate %69 by %c18_i32_57 dim 1 : vector<16x384xf32>, i32 -> vector<16x384xf32>
    %71 = arith.truncf %70 : vector<16x384xf32> to vector<16x384xbf16>
    %c16_58 = arith.constant 16 : index
    %c0_59 = arith.constant 0 : index
    %72 = vector.load %arg16[%c16_58, %c0_59] : memref<144x384xbf16, #tpu.memory_space<vmem>>, vector<16x384xbf16>
    tpu.vector_store %arg16[%c16_58, %c0_59], %71 {strides = array<i32>} : memref<144x384xbf16, #tpu.memory_space<vmem>>, vector<16x384xbf16>,
    %c0_60 = arith.constant 0 : index
    %c0_61 = arith.constant 0 : index
    %73 = vector.load %arg15[%c0_60, %c0_61] : memref<16x384xf32, #tpu.memory_space<vmem>>, vector<16x384xf32>
    %c17_i32_62 = arith.constant 17 : i32
    %74 = tpu.dynamic_rotate %73 by %c17_i32_62 dim 1 : vector<16x384xf32>, i32 -> vector<16x384xf32>
    %75 = arith.truncf %74 : vector<16x384xf32> to vector<16x384xbf16>
    %c32_63 = arith.constant 32 : index
    %c0_64 = arith.constant 0 : index
    %76 = vector.load %arg16[%c32_63, %c0_64] : memref<144x384xbf16, #tpu.memory_space<vmem>>, vector<16x384xbf16>
    tpu.vector_store %arg16[%c32_63, %c0_64], %75 {strides = array<i32>} : memref<144x384xbf16, #tpu.memory_space<vmem>>, vector<16x384xbf16>,
    %c0_65 = arith.constant 0 : index
    %c0_66 = arith.constant 0 : index
    %77 = vector.load %arg15[%c0_65, %c0_66] : memref<16x384xf32, #tpu.memory_space<vmem>>, vector<16x384xf32>
    %c1_i32_67 = arith.constant 1 : i32
    %78 = tpu.dynamic_rotate %77 by %c1_i32_67 dim 1 : vector<16x384xf32>, i32 -> vector<16x384xf32>
    %79 = arith.truncf %78 : vector<16x384xf32> to vector<16x384xbf16>
    %c48_68 = arith.constant 48 : index
    %c0_69 = arith.constant 0 : index
    %80 = vector.load %arg16[%c48_68, %c0_69] : memref<144x384xbf16, #tpu.memory_space<vmem>>, vector<16x384xbf16>
    tpu.vector_store %arg16[%c48_68, %c0_69], %79 {strides = array<i32>} : memref<144x384xbf16, #tpu.memory_space<vmem>>, vector<16x384xbf16>,
    %c0_70 = arith.constant 0 : index
    %c0_71 = arith.constant 0 : index
    %81 = vector.load %arg15[%c0_70, %c0_71] : memref<16x384xf32, #tpu.memory_space<vmem>>, vector<16x384xf32>
    %c0_i32_72 = arith.constant 0 : i32
    %82 = tpu.dynamic_rotate %81 by %c0_i32_72 dim 1 : vector<16x384xf32>, i32 -> vector<16x384xf32>
    %83 = arith.truncf %82 : vector<16x384xf32> to vector<16x384xbf16>
    %c64_73 = arith.constant 64 : index
    %c0_74 = arith.constant 0 : index
    %84 = vector.load %arg16[%c64_73, %c0_74] : memref<144x384xbf16, #tpu.memory_space<vmem>>, vector<16x384xbf16>
    tpu.vector_store %arg16[%c64_73, %c0_74], %83 {strides = array<i32>} : memref<144x384xbf16, #tpu.memory_space<vmem>>, vector<16x384xbf16>,
    %c0_75 = arith.constant 0 : index
    %c0_76 = arith.constant 0 : index
    %85 = vector.load %arg15[%c0_75, %c0_76] : memref<16x384xf32, #tpu.memory_space<vmem>>, vector<16x384xf32>
    %c383_i32_77 = arith.constant 383 : i32
    %86 = tpu.dynamic_rotate %85 by %c383_i32_77 dim 1 : vector<16x384xf32>, i32 -> vector<16x384xf32>
    %87 = arith.truncf %86 : vector<16x384xf32> to vector<16x384xbf16>
    %c80_78 = arith.constant 80 : index
    %c0_79 = arith.constant 0 : index
    %88 = vector.load %arg16[%c80_78, %c0_79] : memref<144x384xbf16, #tpu.memory_space<vmem>>, vector<16x384xbf16>
    tpu.vector_store %arg16[%c80_78, %c0_79], %87 {strides = array<i32>} : memref<144x384xbf16, #tpu.memory_space<vmem>>, vector<16x384xbf16>,
    %c0_80 = arith.constant 0 : index
    %c0_81 = arith.constant 0 : index
    %89 = vector.load %arg15[%c0_80, %c0_81] : memref<16x384xf32, #tpu.memory_space<vmem>>, vector<16x384xf32>
    %c367_i32_82 = arith.constant 367 : i32
    %90 = tpu.dynamic_rotate %89 by %c367_i32_82 dim 1 : vector<16x384xf32>, i32 -> vector<16x384xf32>
    %91 = arith.truncf %90 : vector<16x384xf32> to vector<16x384xbf16>
    %c96_83 = arith.constant 96 : index
    %c0_84 = arith.constant 0 : index
    %92 = vector.load %arg16[%c96_83, %c0_84] : memref<144x384xbf16, #tpu.memory_space<vmem>>, vector<16x384xbf16>
    tpu.vector_store %arg16[%c96_83, %c0_84], %91 {strides = array<i32>} : memref<144x384xbf16, #tpu.memory_space<vmem>>, vector<16x384xbf16>,
    %c0_85 = arith.constant 0 : index
    %c0_86 = arith.constant 0 : index
    %93 = vector.load %arg15[%c0_85, %c0_86] : memref<16x384xf32, #tpu.memory_space<vmem>>, vector<16x384xf32>
    %c366_i32_87 = arith.constant 366 : i32
    %94 = tpu.dynamic_rotate %93 by %c366_i32_87 dim 1 : vector<16x384xf32>, i32 -> vector<16x384xf32>
    %95 = arith.truncf %94 : vector<16x384xf32> to vector<16x384xbf16>
    %c112_88 = arith.constant 112 : index
    %c0_89 = arith.constant 0 : index
    %96 = vector.load %arg16[%c112_88, %c0_89] : memref<144x384xbf16, #tpu.memory_space<vmem>>, vector<16x384xbf16>
    tpu.vector_store %arg16[%c112_88, %c0_89], %95 {strides = array<i32>} : memref<144x384xbf16, #tpu.memory_space<vmem>>, vector<16x384xbf16>,
    %c0_90 = arith.constant 0 : index
    %c0_91 = arith.constant 0 : index
    %97 = vector.load %arg15[%c0_90, %c0_91] : memref<16x384xf32, #tpu.memory_space<vmem>>, vector<16x384xf32>
    %c365_i32_92 = arith.constant 365 : i32
    %98 = tpu.dynamic_rotate %97 by %c365_i32_92 dim 1 : vector<16x384xf32>, i32 -> vector<16x384xf32>
    %99 = arith.truncf %98 : vector<16x384xf32> to vector<16x384xbf16>
    %c128_93 = arith.constant 128 : index
    %c0_94 = arith.constant 0 : index
    %100 = vector.load %arg16[%c128_93, %c0_94] : memref<144x384xbf16, #tpu.memory_space<vmem>>, vector<16x384xbf16>
    tpu.vector_store %arg16[%c128_93, %c0_94], %99 {strides = array<i32>} : memref<144x384xbf16, #tpu.memory_space<vmem>>, vector<16x384xbf16>,
    %c0_95 = arith.constant 0 : index
    %c0_96 = arith.constant 0 : index
    %101 = vector.load %arg8[%c0_95, %c0_96] : memref<16x144xbf16, #tpu.memory_space<vmem>>, vector<16x144xbf16>
    %c0_97 = arith.constant 0 : index
    %c0_98 = arith.constant 0 : index
    %102 = vector.load %arg16[%c0_97, %c0_98] : memref<144x384xbf16, #tpu.memory_space<vmem>>, vector<144x384xbf16>
    %cst_99 = arith.constant dense<0.000000e+00> : vector<16x384xf32>
    %103 = tpu.matmul %101, %102, %cst_99 {dimension_numbers = #tpu.dot_dimension_numbers<[1], [0], [0], [1], [0, 0, 1, 1], [], []>} : vector<16x144xbf16>, vector<144x384xbf16>, vector<16x384xf32> -> vector<16x384xf32>
    %c0_100 = arith.constant 0 : index
    %c0_101 = arith.constant 0 : index
    %104 = vector.load %arg9[%c0_100, %c0_101] : memref<16x1xf32, #tpu.memory_space<vmem>>, vector<16x1xf32>
    %105 = vector.broadcast %104 : vector<16x1xf32> to vector<16x384xf32>
    %106 = arith.mulf %103, %105 : vector<16x384xf32>
    %c0_102 = arith.constant 0 : index
    %c0_103 = arith.constant 0 : index
    %107 = vector.load %arg10[%c0_102, %c0_103] : memref<16x1xf32, #tpu.memory_space<vmem>>, vector<16x1xf32>
    %108 = vector.broadcast %107 : vector<16x1xf32> to vector<16x384xf32>
    %109 = arith.addf %106, %108 : vector<16x384xf32>
    %cst_104 = arith.constant 0.000000e+00 : f32
    %110 = vector.broadcast %cst_104 : f32 to vector<16x384xf32>
    %111 = arith.cmpf oge, %109, %110 : vector<16x384xf32>
    %cst_105 = arith.constant 2.000000e-01 : f32
    %112 = vector.broadcast %cst_105 : f32 to vector<16x384xf32>
    %113 = arith.mulf %112, %109 : vector<16x384xf32>
    %114 = arith.select %111, %109, %113 : vector<16x384xi1>, vector<16x384xf32>
    %115 = arith.truncf %114 : vector<16x384xf32> to vector<16x384xbf16>
    %c0_106 = arith.constant 0 : index
    %c0_107 = arith.constant 0 : index
    %116 = vector.load %arg16[%c0_106, %c0_107] : memref<144x384xbf16, #tpu.memory_space<vmem>>, vector<16x384xbf16>
    tpu.vector_store %arg16[%c0_106, %c0_107], %115 {strides = array<i32>} : memref<144x384xbf16, #tpu.memory_space<vmem>>, vector<16x384xbf16>,
    %c0_108 = arith.constant 0 : index
    %c0_109 = arith.constant 0 : index
    %117 = vector.load %arg11[%c0_108, %c0_109] : memref<16x16xbf16, #tpu.memory_space<vmem>>, vector<16x16xbf16>
    %c0_110 = arith.constant 0 : index
    %c0_111 = arith.constant 0 : index
    %118 = vector.load %arg16[%c0_110, %c0_111] : memref<144x384xbf16, #tpu.memory_space<vmem>>, vector<16x384xbf16>
    %cst_112 = arith.constant dense<0.000000e+00> : vector<16x384xf32>
    %119 = tpu.matmul %117, %118, %cst_112 {dimension_numbers = #tpu.dot_dimension_numbers<[1], [0], [0], [1], [0, 0, 1, 1], [], []>} : vector<16x16xbf16>, vector<16x384xbf16>, vector<16x384xf32> -> vector<16x384xf32>
    %c0_113 = arith.constant 0 : index
    %c0_114 = arith.constant 0 : index
    %120 = vector.load %arg12[%c0_113, %c0_114] : memref<16x1xf32, #tpu.memory_space<vmem>>, vector<16x1xf32>
    %121 = vector.broadcast %120 : vector<16x1xf32> to vector<16x384xf32>
    %122 = arith.mulf %119, %121 : vector<16x384xf32>
    %c0_115 = arith.constant 0 : index
    %c0_116 = arith.constant 0 : index
    %123 = vector.load %arg13[%c0_115, %c0_116] : memref<16x1xf32, #tpu.memory_space<vmem>>, vector<16x1xf32>
    %124 = vector.broadcast %123 : vector<16x1xf32> to vector<16x384xf32>
    %125 = arith.addf %122, %124 : vector<16x384xf32>
    %cst_117 = arith.constant 0.000000e+00 : f32
    %126 = vector.broadcast %cst_117 : f32 to vector<16x384xf32>
    %127 = arith.cmpf oge, %125, %126 : vector<16x384xf32>
    %cst_118 = arith.constant 2.000000e-01 : f32
    %128 = vector.broadcast %cst_118 : f32 to vector<16x384xf32>
    %129 = arith.mulf %128, %125 : vector<16x384xf32>
    %130 = arith.select %127, %125, %129 : vector<16x384xi1>, vector<16x384xf32>
    %c0_119 = arith.constant 0 : index
    %c0_120 = arith.constant 0 : index
    %c0_121 = arith.constant 0 : index
    %131 = vector.load %arg14[%c0_119, %c0_120, %c0_121] : memref<1x16x384xf32, #tpu.memory_space<vmem>>, vector<1x16x384xf32>
    %132 = vector.shape_cast %131 : vector<1x16x384xf32> to vector<16x384xf32>
    %133 = vector.shape_cast %130 : vector<16x384xf32> to vector<1x16x384xf32>
    tpu.vector_store %arg14[%c0_119, %c0_120, %c0_121], %133 {strides = array<i32>} : memref<1x16x384xf32, #tpu.memory_space<vmem>>, vector<1x16x384xf32>,
    return
  }
  func.func @transform_0(%arg0: i32) -> (i32, i32, i32) {
    %c0_i32 = arith.constant 0 : i32
    %c0_i32_0 = arith.constant 0 : i32
    %c0_i32_1 = arith.constant 0 : i32
    return %arg0, %c0_i32, %c0_i32_0 : i32, i32, i32
  }
  func.func @transform_1(%arg0: i32) -> (i32, i32) {
    %c0_i32 = arith.constant 0 : i32
    %c0_i32_0 = arith.constant 0 : i32
    %c0_i32_1 = arith.constant 0 : i32
    return %c0_i32, %c0_i32_0 : i32, i32
  }
  func.func @transform_2(%arg0: i32) -> (i32, i32) {
    %c0_i32 = arith.constant 0 : i32
    %c0_i32_0 = arith.constant 0 : i32
    %c0_i32_1 = arith.constant 0 : i32
    return %c0_i32, %c0_i32_0 : i32, i32
  }
  func.func @transform_3(%arg0: i32) -> (i32, i32) {
    %c0_i32 = arith.constant 0 : i32
    %c0_i32_0 = arith.constant 0 : i32
    %c0_i32_1 = arith.constant 0 : i32
    return %c0_i32, %c0_i32_0 : i32, i32
  }
  func.func @transform_4(%arg0: i32) -> (i32, i32) {
    %c0_i32 = arith.constant 0 : i32
    %c0_i32_0 = arith.constant 0 : i32
    %c0_i32_1 = arith.constant 0 : i32
    return %c0_i32, %c0_i32_0 : i32, i32
  }
  func.func @transform_5(%arg0: i32) -> (i32, i32) {
    %c0_i32 = arith.constant 0 : i32
    %c0_i32_0 = arith.constant 0 : i32
    %c0_i32_1 = arith.constant 0 : i32
    return %c0_i32, %c0_i32_0 : i32, i32
  }
  func.func @transform_6(%arg0: i32) -> (i32, i32) {
    %c0_i32 = arith.constant 0 : i32
    %c0_i32_0 = arith.constant 0 : i32
    %c0_i32_1 = arith.constant 0 : i32
    return %c0_i32, %c0_i32_0 : i32, i32
  }
  func.func @transform_7(%arg0: i32) -> (i32, i32) {
    %c0_i32 = arith.constant 0 : i32
    %c0_i32_0 = arith.constant 0 : i32
    %c0_i32_1 = arith.constant 0 : i32
    return %c0_i32, %c0_i32_0 : i32, i32
  }
  func.func @transform_8(%arg0: i32) -> (i32, i32) {
    %c0_i32 = arith.constant 0 : i32
    %c0_i32_0 = arith.constant 0 : i32
    %c0_i32_1 = arith.constant 0 : i32
    return %c0_i32, %c0_i32_0 : i32, i32
  }
  func.func @transform_9(%arg0: i32) -> (i32, i32) {
    %c0_i32 = arith.constant 0 : i32
    %c0_i32_0 = arith.constant 0 : i32
    %c0_i32_1 = arith.constant 0 : i32
    return %c0_i32, %c0_i32_0 : i32, i32
  }
  func.func @transform_10(%arg0: i32) -> (i32, i32) {
    %c0_i32 = arith.constant 0 : i32
    %c0_i32_0 = arith.constant 0 : i32
    %c0_i32_1 = arith.constant 0 : i32
    return %c0_i32, %c0_i32_0 : i32, i32
  }
  func.func @transform_11(%arg0: i32) -> (i32, i32) {
    %c0_i32 = arith.constant 0 : i32
    %c0_i32_0 = arith.constant 0 : i32
    %c0_i32_1 = arith.constant 0 : i32
    return %c0_i32, %c0_i32_0 : i32, i32
  }
  func.func @transform_12(%arg0: i32) -> (i32, i32) {
    %c0_i32 = arith.constant 0 : i32
    %c0_i32_0 = arith.constant 0 : i32
    %c0_i32_1 = arith.constant 0 : i32
    return %c0_i32, %c0_i32_0 : i32, i32
  }
  func.func @transform_13(%arg0: i32) -> (i32, i32, i32) {
    %c0_i32 = arith.constant 0 : i32
    %c0_i32_0 = arith.constant 0 : i32
    %c0_i32_1 = arith.constant 0 : i32
    return %arg0, %c0_i32, %c0_i32_0 : i32, i32, i32
  }
}

</mosaic_0001>

<bundles_post_ra>
// kernel: decoder_block_apply.1
= control target key start
LH: loop header
LB: loop body
LE: loop exit
PB: predicated region body
PF: predicated region fallthrough
CT: control target
= control target key end

     0   :  { %s2002_s25 = smov 0   ;;  %s2471_s0 = inlined_call_operand.vmem [shape: f32[2,16,384], index: 0, kind: input, shape index: {}]   ;;  %s2472_s1 = inlined_call_operand.vmem [shape: f32[1,384], index: 1, kind: input, shape index: {}]   ;;  %s2473_s2 = inlined_call_operand.vmem [shape: f32[16,1], index: 2, kind: input, shape index: {}]   ;;  %s2474_s3 = inlined_call_operand.vmem [shape: f32[16,1], index: 3, kind: input, shape index: {}]   ;;  %s2475_s4 = inlined_call_operand.vmem [shape: bf16[16,144], index: 4, kind: input, shape index: {}]   ;;  %s2476_s5 = inlined_call_operand.vmem [shape: f32[16,1], index: 5, kind: input, shape index: {}]   ;;  %s2477_s6 = inlined_call_operand.vmem [shape: f32[16,1], index: 6, kind: input, shape index: {}]   ;;  %s2478_s7 = inlined_call_operand.vmem [shape: bf16[16,144], index: 7, kind: input, shape index: {}]   ;;  %s2479_s8 = inlined_call_operand.vmem [shape: f32[16,1], index: 8, kind: input, shape index: {}]   ;;  %s2480_s9 = inlined_call_operand.vmem [shape: f32[16,1], index: 9, kind: input, shape index: {}]   ;;  %s2481_s10 = inlined_call_operand.vmem [shape: bf16[16,16], index: 10, kind: input, shape index: {}]   ;;  %s2482_s11 = inlined_call_operand.vmem [shape: f32[16,1], index: 11, kind: input, shape index: {}]   ;;  %s2483_s12 = inlined_call_operand.vmem [shape: f32[16,1], index: 12, kind: input, shape index: {}]   ;;  %s2484_s13 = inlined_call_operand.vmem [shape: f32[2,16,384], index: 13, kind: output, shape index: {}]  }
   0x1 LB: > { %s1616_s26 = sadd.s32 4294967295, %s1919_s25   ;;  %p1620_p0 = scmp.ge.s32.totalorder %s1919_s25, 1  ;;  %s1919_s25 = sphi %s2002_s25, %s23_s25  }
   0x2   : > { %p387_p1 = scmp.lt.s32.totalorder %s1919_s25, 3 }
   0x4   : > { %p388_p2 = pnand %p1620_p0, %p387_p1 }
   0x5   : > { %v467_v0 = vld [vmem:[%s2474_s3] sm:$0xff] (!%p388_p2)  ;;  %v1921_v2 = vmov (!%p388_p2), 0   ;;  %v468_v3 = vld [vmem:[%s2474_s3 + $0x8] sm:$0xff] (!%p388_p2)  ;;  %p431_p3 = scmp.lt.s32.totalorder (!%p388_p2), %s1616_s26, 1  ;;  %v486_v5 = vlaneseq (!%p388_p2)  ;;  %s1922_s24 = smov (!%p388_p2), 19   ;;  %vm813_vm0 = vcmask (!%p388_p2), 130048  }
   0x6   : > { %391 = sbr.rel (%p388_p2) target bundleno = 1161 (0x489), region = 72  ;;  %v449_v1 = vld [vmem:[%s2473_s2] sm:$0xff] (!%p388_p2)  ;;  %1665 = vset.pattern.permute.xlu1 (!%p388_p2), %v1921_v2  ;;  %1664 = vset.pattern.permute.xlu0 (!%p388_p2), %v1921_v2  ;;  %v450_v4 = vld [vmem:[%s2473_s2 + $0x8] sm:$0xff] (!%p388_p2)  ;;  %s1923_s27 = smov (!%p388_p2), 18   ;;  %vm1931_vm15 = vmmov (!%p388_p2), 0  }
   0x7   : > { %471 = vperm.xlu1 (!%p388_p2), %1665, %v467_v0   ;;  %453 = vperm.xlu0 (!%p388_p2), %1664, %v449_v1   ;;  %v487_v6 = vshrl.u32 (!%p388_p2), %v486_v5, 7  ;;  %v442_v14 = vld [vmem:[%s2472_s1] sm:$0x7] (!%p388_p2)  ;;  %s1924_s28 = smov (!%p388_p2), 17   ;;  %s1925_s29 = smov (!%p388_p2), 1   ;;  %v902_v50 = vld [vmem:[%s2476_s5 + $0x8] sm:$0xff] (!%p388_p2) }
   0x8   : > { %860 = vmatprep.subr.bf16.mxu1 (!%p388_p2), %v1921_v2  ;;  %s1926_s30 = smov (!%p388_p2), 127   ;;  %s1927_s14 = smov (!%p388_p2), 111   ;;  %v1908_v48 = vld [vmem:[%s2475_s4 + $0x4] ss:$8 sps:$4 sm:$0xff] (!%p388_p2)   ;;  %v2115_v53 = vand.u32 (!%p388_p2), 127, %v486_v5 }
   0x9   : > { %v488_v11 = vsub.s32 (!%p388_p2), 0, %v487_v6  ;;  %v492_v13 = vsub.s32 (!%p388_p2), 1, %v487_v6  ;;  %v496_v20 = vsub.s32 (!%p388_p2), 2, %v487_v6  ;;  %s2486_s15 = smov (!%p388_p2), 110   ;;  %1626 = vmatprep.mubr.msk.bf16.mxu1 (!%p388_p2), %vm813_vm0, %v1908_v48  ;;  %s1929_s19 = smov (!%p388_p2), 109   ;;  %1625 = vmatprep.mubr.msk.bf16.mxu0 (!%p388_p2), %vm813_vm0, %v1908_v48  ;;  %v901_v49 = vld [vmem:[%s2476_s5] sm:$0xff] (!%p388_p2) }
   0xa   : > { %v919_v51 = vld [vmem:[%s2477_s6] sm:$0xff] (!%p388_p2)  ;;  %v920_v52 = vld [vmem:[%s2477_s6 + $0x8] sm:$0xff] (!%p388_p2)  ;;  %vm533_vm1 = vcmp.lt.s32.totalorder (!%p388_p2), %v2115_v53, 19  ;;  %vm564_vm2 = vcmp.lt.s32.totalorder (!%p388_p2), %v2115_v53, 18  ;;  %vm595_vm3 = vcmp.lt.s32.totalorder (!%p388_p2), %v2115_v53, 17  ;;  %vm626_vm4 = vcmp.lt.s32.totalorder (!%p388_p2), %v2115_v53, 1 }
   0xb   : > { %476 = vperm.xlu1 (!%p388_p2), %1665, %v468_v3   ;;  %458 = vperm.xlu0 (!%p388_p2), %1664, %v450_v4   ;;  %v2037_v24 = vrot.slane (!%p388_p2), %v442_v14, %v488_v11  ;;  %v2039_v27 = vrot.slane (!%p388_p2), %v442_v14, %v492_v13  ;;  %v2041_v35 = vrot.slane (!%p388_p2), %v442_v14, %v496_v20  ;;  %vm669_vm5 = vcmp.lt.s32.totalorder (!%p388_p2), %v2115_v53, 127 }
   0xc   : > { %vm700_vm6 = vcmp.lt.s32.totalorder (!%p388_p2), %v2115_v53, 111  ;;  %vm731_vm7 = vcmp.lt.s32.totalorder (!%p388_p2), %v2115_v53, 110  ;;  %vm762_vm8 = vcmp.lt.s32.totalorder (!%p388_p2), %v2115_v53, 109 }
   0xd   : > { %s2491_s26 = smov (!%p431_p3, %s1616_s26), 1 }
   0xe   : > { %s2485_s18 = smul.u32 48, %s2491_s26 }
   0xf   : > { %s2489_s22 = smul.u32 48, %s2491_s26 }
  0x10   : > { %s435_s21 = scalar_lea.vmem %s2471_s0, %s2485_s18 }
  0x11   : > { %v443_v7 = vld [vmem:[%s435_s21] sm:$0xff]  ;;  %v444_v8 = vld [vmem:[%s435_s21 + $0x8] sm:$0xff]  ;;  %v445_v15 = vld [vmem:[%s435_s21 + $0x10] sm:$0xff] }
  0x12   : > { %v446_v17 = vld [vmem:[%s435_s21 + $0x18] sm:$0xff]  ;;  %v447_v18 = vld [vmem:[%s435_s21 + $0x20] sm:$0xff]  ;;  %v448_v19 = vld [vmem:[%s435_s21 + $0x28] sm:$0xff] }
  0x86   : > { %v472_v9 = vpop.permute.xlu1 %471  ;;  %v454_v10 = vpop.permute.xlu0 %453 }
  0x87   : > { %v461_v12 = vmul.f32 %v454_v10, %v443_v7  ;;  %v462_v16 = vmul.f32 %v454_v10, %v444_v8  ;;  %v463_v22 = vmul.f32 %v454_v10, %v445_v15 }
  0x89   : > { %v479_v23 = vadd.f32 %v472_v9, %v461_v12  ;;  %v480_v26 = vadd.f32 %v472_v9, %v462_v16  ;;  %v481_v34 = vadd.f32 %v472_v9, %v463_v22 }
  0x8a   : > { %v459_v21 = vpop.permute.xlu0 %458  ;;  %v477_v28 = vpop.permute.xlu1 %476 }
  0x8b   : > { %v464_v25 = vmul.f32 %v459_v21, %v446_v17  ;;  %v465_v29 = vmul.f32 %v459_v21, %v447_v18  ;;  %v466_v30 = vmul.f32 %v459_v21, %v448_v19  ;;  %v2044_v36 = vmul.f32 %v2037_v24, %v479_v23 }
  0x8c   : > { %v2050_v38 = vmul.f32 %v2039_v27, %v480_v26  ;;  %v2063_v43 = vmul.f32 %v2041_v35, %v481_v34 }
  0x8d   : > { %v482_v31 = vadd.f32 %v477_v28, %v464_v25  ;;  %v483_v32 = vadd.f32 %v477_v28, %v465_v29  ;;  %v484_v33 = vadd.f32 %v477_v28, %v466_v30 }
  0x8f   : > { %v2047_v37 = vmul.f32 %v2037_v24, %v482_v31  ;;  %v2053_v39 = vmul.f32 %v2039_v27, %v483_v32  ;;  %v2056_v40 = vmul.f32 %v2041_v35, %v484_v33 }
  0x91   : > { %v1666_v41 = vpack.i.bf16 %v2047_v37, %v2044_v36  ;;  %v1671_v42 = vpack.i.bf16 %v2053_v39, %v2050_v38  ;;  %v1676_v44 = vpack.i.bf16 %v2056_v40, %v2063_v43  ;;  %v646_v45 = vpack.c.bf16 %v2053_v39, %v2050_v38 }
  0x92   : > { %v647_v46 = vpack.c.bf16 %v2056_v40, %v2063_v43  ;;  %v645_v47 = vpack.c.bf16 %v2047_v37, %v2044_v36 }
  0x93   : > { %1667 = vrot.lane.b32.xlu0 %v1666_v41, %s1922_s24  ;;  %1672 = vrot.lane.b32.xlu1 %v1671_v42, %s1922_s24 }
  0x97   : > { %1677 = vrot.lane.b32.xlu0 %v1676_v44, %s1922_s24  ;;  %1682 = vrot.lane.b32.xlu1 %v1666_v41, %s1923_s27 }
  0x9b   : > { %1687 = vrot.lane.b32.xlu0 %v1671_v42, %s1923_s27  ;;  %1692 = vrot.lane.b32.xlu1 %v1676_v44, %s1923_s27 }
  0x9f   : > { %1697 = vrot.lane.b32.xlu0 %v1666_v41, %s1924_s28  ;;  %1702 = vrot.lane.b32.xlu1 %v1671_v42, %s1924_s28 }
  0xa3   : > { %1707 = vrot.lane.b32.xlu0 %v1676_v44, %s1924_s28  ;;  %1712 = vrot.lane.b32.xlu1 %v1666_v41, %s1925_s29 }
  0xa7   : > { %1717 = vrot.lane.b32.xlu0 %v1671_v42, %s1925_s29  ;;  %1722 = vrot.lane.b32.xlu1 %v1676_v44, %s1925_s29 }
  0xab   : > { %1727 = vrot.lane.b32.xlu0 %v1671_v42, %s1926_s30  ;;  %1732 = vrot.lane.b32.xlu1 %v1676_v44, %s1926_s30 }
  0xaf   : > { %1737 = vrot.lane.b32.xlu0 %v1666_v41, %s1926_s30  ;;  %1742 = vrot.lane.b32.xlu1 %v1671_v42, %s1927_s14 }
  0xb3   : > { %1747 = vrot.lane.b32.xlu0 %v1676_v44, %s1927_s14  ;;  %1752 = vrot.lane.b32.xlu1 %v1666_v41, %s1927_s14 }
  0xb7   : > { %1757 = vrot.lane.b32.xlu0 %v1671_v42, %s2486_s15  ;;  %1762 = vrot.lane.b32.xlu1 %v1676_v44, %s2486_s15 }
  0xbb   : > { %1767 = vrot.lane.b32.xlu0 %v1666_v41, %s2486_s15  ;;  %1772 = vrot.lane.b32.xlu1 %v1671_v42, %s1929_s19 }
  0xbf   : > { %1777 = vrot.lane.b32.xlu0 %v1676_v44, %s1929_s19  ;;  %1782 = vrot.lane.b32.xlu1 %v1666_v41, %s1929_s19 }
  0xc3   : > { %905 = vperm.xlu0 %1664, %v901_v49   ;;  %910 = vperm.xlu1 %1665, %v902_v50  }
  0xc7   : > { %923 = vperm.xlu0 %1664, %v919_v51   ;;  %928 = vperm.xlu1 %1665, %v920_v52  }
 0x105   : > { %v1668_v54 = vpop.permute.xlu0 %1667  ;;  %v1673_v55 = vpop.permute.xlu1 %1672 }
 0x106   : > { %v1670_v56 = vunpack.i.h.bf16 %v1668_v54  ;;  %v1669_v57 = vunpack.i.l.bf16 %v1668_v54  ;;  %v1675_v58 = vunpack.i.h.bf16 %v1673_v55  ;;  %v1674_v59 = vunpack.i.l.bf16 %v1673_v55 }
 0x108   : > { %v536_v61 = vsel %vm533_vm1, %v1669_v57, %v1674_v59  ;;  %v537_v62 = vsel %vm533_vm1, %v1670_v56, %v1675_v58 }
 0x109   : > { %v1678_v60 = vpop.permute.xlu0 %1677  ;;  %v1683_v63 = vpop.permute.xlu1 %1682  ;;  %v541_v3 = vpack.c.bf16 %v537_v62, %v536_v61 }
 0x10a   : > { %v1680_v0 = vunpack.i.h.bf16 %v1678_v60  ;;  %v1679_v1 = vunpack.i.l.bf16 %v1678_v60  ;;  %v1685_v11 = vunpack.i.h.bf16 %v1683_v63  ;;  %v1684_v12 = vunpack.i.l.bf16 %v1683_v63 }
 0x10b   : > { %817 = vmatprep.subr.bf16.mxu0 %v541_v3 }
 0x10c   : > { %v538_v4 = vsel %vm533_vm1, %v1679_v1, %v1669_v57  ;;  %v539_v5 = vsel %vm533_vm1, %v1680_v0, %v1670_v56  ;;  %v534_v6 = vsel %vm533_vm1, %v1674_v59, %v1679_v1  ;;  %v535_v7 = vsel %vm533_vm1, %v1675_v58, %v1680_v0 }
 0x10d   : > { %v1688_v8 = vpop.permute.xlu0 %1687  ;;  %v540_v9 = vpack.c.bf16 %v539_v5, %v538_v4  ;;  %v542_v10 = vpack.c.bf16 %v535_v7, %v534_v6  ;;  %v1693_v13 = vpop.permute.xlu1 %1692 }
 0x10e   : > { %v1690_v14 = vunpack.i.h.bf16 %v1688_v8  ;;  %v1689_v15 = vunpack.i.l.bf16 %v1688_v8  ;;  %v1695_v16 = vunpack.i.h.bf16 %v1693_v13  ;;  %v1694_v17 = vunpack.i.l.bf16 %v1693_v13 }
 0x10f   : > { %818 = vmatpush1.bf16.msra.mxu0 %v540_v9  ;;  %861 = vmatpush1.bf16.msra.mxu1 %v542_v10 }
 0x110   : > { %862 = vmatprep.subr.bf16.mxu1 %v1921_v2  ;;  %v567_v18 = vsel %vm564_vm2, %v1684_v12, %v1689_v15  ;;  %v568_v19 = vsel %vm564_vm2, %v1685_v11, %v1690_v14  ;;  %v565_v22 = vsel %vm564_vm2, %v1689_v15, %v1694_v17  ;;  %v566_v23 = vsel %vm564_vm2, %v1690_v14, %v1695_v16 }
 0x111   : > { %v1698_v20 = vpop.permute.xlu0 %1697  ;;  %v572_v21 = vpack.c.bf16 %v568_v19, %v567_v18  ;;  %v569_v25 = vsel %vm564_vm2, %v1694_v17, %v1684_v12  ;;  %v1703_v26 = vpop.permute.xlu1 %1702  ;;  %v573_v30 = vpack.c.bf16 %v566_v23, %v565_v22  ;;  %v570_v31 = vsel %vm564_vm2, %v1695_v16, %v1685_v11 }
 0x112   : > { %v1700_v28 = vunpack.i.h.bf16 %v1698_v20  ;;  %v1699_v29 = vunpack.i.l.bf16 %v1698_v20  ;;  %v1705_v32 = vunpack.i.h.bf16 %v1703_v26  ;;  %v1704_v33 = vunpack.i.l.bf16 %v1703_v26 }
 0x113   : > { %819 = vmatprep.subr.bf16.mxu0 %v572_v21  ;;  %v571_v34 = vpack.c.bf16 %v570_v31, %v569_v25  ;;  %863 = vmatpush1.bf16.msra.mxu1 %v573_v30 }
 0x114   : > { %v598_v42 = vsel %vm595_vm3, %v1699_v29, %v1704_v33  ;;  %v599_v44 = vsel %vm595_vm3, %v1700_v28, %v1705_v32  ;;  %864 = vmatprep.subr.bf16.mxu1 %v1921_v2 }
 0x115   : > { %820 = vmatpush1.bf16.msra.mxu0 %v571_v34  ;;  %v1708_v41 = vpop.permute.xlu0 %1707  ;;  %v1713_v48 = vpop.permute.xlu1 %1712  ;;  %v603_v51 = vpack.c.bf16 %v599_v44, %v598_v42 }
 0x116   : > { %v1710_v49 = vunpack.i.h.bf16 %v1708_v41  ;;  %v1709_v50 = vunpack.i.l.bf16 %v1708_v41  ;;  %v1715_v60 = vunpack.i.h.bf16 %v1713_v48  ;;  %v1714_v61 = vunpack.i.l.bf16 %v1713_v48 }
 0x117   : > { %821 = vmatprep.subr.bf16.mxu0 %v603_v51 }
 0x118   : > { %v600_v52 = vsel %vm595_vm3, %v1709_v50, %v1699_v29  ;;  %v601_v54 = vsel %vm595_vm3, %v1710_v49, %v1700_v28  ;;  %v596_v55 = vsel %vm595_vm3, %v1704_v33, %v1709_v50  ;;  %v597_v56 = vsel %vm595_vm3, %v1705_v32, %v1710_v49 }
 0x119   : > { %v1718_v57 = vpop.permute.xlu0 %1717  ;;  %v602_v58 = vpack.c.bf16 %v601_v54, %v600_v52  ;;  %v604_v59 = vpack.c.bf16 %v597_v56, %v596_v55  ;;  %v1723_v62 = vpop.permute.xlu1 %1722 }
 0x11a   : > { %v1720_v63 = vunpack.i.h.bf16 %v1718_v57  ;;  %v1719_v0 = vunpack.i.l.bf16 %v1718_v57  ;;  %v1725_v1 = vunpack.i.h.bf16 %v1723_v62  ;;  %v1724_v3 = vunpack.i.l.bf16 %v1723_v62 }
 0x11b   : > { %822 = vmatpush1.bf16.msra.mxu0 %v602_v58  ;;  %865 = vmatpush1.bf16.msra.mxu1 %v604_v59 }
 0x11c   : > { %866 = vmatprep.subr.bf16.mxu1 %v1921_v2  ;;  %v629_v4 = vsel %vm626_vm4, %v1714_v61, %v1719_v0  ;;  %v630_v5 = vsel %vm626_vm4, %v1715_v60, %v1720_v63  ;;  %v627_v8 = vsel %vm626_vm4, %v1719_v0, %v1724_v3  ;;  %v628_v9 = vsel %vm626_vm4, %v1720_v63, %v1725_v1 }
 0x11d   : > { %v1728_v6 = vpop.permute.xlu0 %1727  ;;  %v634_v7 = vpack.c.bf16 %v630_v5, %v629_v4  ;;  %v631_v10 = vsel %vm626_vm4, %v1724_v3, %v1714_v61  ;;  %v1733_v11 = vpop.permute.xlu1 %1732  ;;  %v635_v14 = vpack.c.bf16 %v628_v9, %v627_v8  ;;  %v632_v15 = vsel %vm626_vm4, %v1725_v1, %v1715_v60 }
 0x11e   : > { %v1730_v12 = vunpack.i.h.bf16 %v1728_v6  ;;  %v1729_v13 = vunpack.i.l.bf16 %v1728_v6  ;;  %v1735_v16 = vunpack.i.h.bf16 %v1733_v11  ;;  %v1734_v17 = vunpack.i.l.bf16 %v1733_v11 }
 0x11f   : > { %823 = vmatprep.subr.bf16.mxu0 %v634_v7  ;;  %v633_v18 = vpack.c.bf16 %v632_v15, %v631_v10  ;;  %867 = vmatpush1.bf16.msra.mxu1 %v635_v14 }
 0x120   : > { %868 = vmatprep.subr.bf16.mxu1 %v1921_v2  ;;  %v670_v20 = vsel %vm669_vm5, %v1729_v13, %v1734_v17  ;;  %v671_v21 = vsel %vm669_vm5, %v1730_v12, %v1735_v16 }
 0x121   : > { %824 = vmatpush1.bf16.msra.mxu0 %v633_v18  ;;  %v1738_v19 = vpop.permute.xlu0 %1737  ;;  %v1743_v22 = vpop.permute.xlu1 %1742  ;;  %v677_v26 = vpack.c.bf16 %v671_v21, %v670_v20 }
 0x122   : > { %v1740_v23 = vunpack.i.h.bf16 %v1738_v19  ;;  %v1739_v25 = vunpack.i.l.bf16 %v1738_v19  ;;  %825 = vmatprep.subr.bf16.mxu0 %v646_v45  ;;  %v1745_v43 = vunpack.i.h.bf16 %v1743_v22  ;;  %v1744_v45 = vunpack.i.l.bf16 %v1743_v22 }
 0x123   : > { %869 = vmatpush1.bf16.msra.mxu1 %v647_v46 }
 0x124   : > { %v674_v28 = vsel %vm669_vm5, %v1734_v17, %v1739_v25  ;;  %v675_v29 = vsel %vm669_vm5, %v1735_v16, %v1740_v23  ;;  %v672_v30 = vsel %vm669_vm5, %v1739_v25, %v1729_v13  ;;  %v673_v31 = vsel %vm669_vm5, %v1740_v23, %v1730_v12  ;;  %870 = vmatprep.subr.bf16.mxu1 %v1921_v2 }
 0x125   : > { %826 = vmatpush1.bf16.msra.mxu0 %v645_v47  ;;  %v1748_v38 = vpop.permute.xlu0 %1747  ;;  %v678_v39 = vpack.c.bf16 %v675_v29, %v674_v28  ;;  %v676_v40 = vpack.c.bf16 %v673_v31, %v672_v30  ;;  %v1753_v46 = vpop.permute.xlu1 %1752  ;;  %v1906_v28 = vld [vmem:[%s2475_s4] ss:$8 sps:$4 sm:$0xff]  }
 0x126   : > { %v1750_v32 = vunpack.i.h.bf16 %v1748_v38  ;;  %v1749_v33 = vunpack.i.l.bf16 %v1748_v38  ;;  %827 = vmatprep.subr.bf16.mxu0 %v677_v26  ;;  %v1755_v34 = vunpack.i.h.bf16 %v1753_v46  ;;  %v1754_v41 = vunpack.i.l.bf16 %v1753_v46 }
 0x127   : > { %871 = vmatpush1.bf16.msra.mxu1 %v678_v39 }
 0x128   : > { %v701_v36 = vsel %vm700_vm6, %v1744_v45, %v1749_v33  ;;  %v702_v37 = vsel %vm700_vm6, %v1745_v43, %v1750_v32  ;;  %872 = vmatprep.subr.bf16.mxu1 %v1921_v2  ;;  %v705_v44 = vsel %vm700_vm6, %v1749_v33, %v1754_v41  ;;  %v706_v48 = vsel %vm700_vm6, %v1750_v32, %v1755_v34 }
 0x129   : > { %828 = vmatpush1.bf16.msra.mxu0 %v676_v40  ;;  %v1758_v47 = vpop.permute.xlu0 %1757  ;;  %v708_v42 = vpack.c.bf16 %v702_v37, %v701_v36  ;;  %v1763_v49 = vpop.permute.xlu1 %1762  ;;  %v709_v52 = vpack.c.bf16 %v706_v48, %v705_v44  ;;  %v703_v54 = vsel %vm700_vm6, %v1754_v41, %v1744_v45  ;;  %v704_v57 = vsel %vm700_vm6, %v1755_v34, %v1745_v43 }
 0x12a   : > { %v1760_v50 = vunpack.i.h.bf16 %v1758_v47  ;;  %v1759_v51 = vunpack.i.l.bf16 %v1758_v47  ;;  %v1765_v55 = vunpack.i.h.bf16 %v1763_v49  ;;  %v1764_v56 = vunpack.i.l.bf16 %v1763_v49 }
 0x12b   : > { %829 = vmatprep.subr.bf16.mxu0 %v708_v42  ;;  %873 = vmatpush1.bf16.msra.mxu1 %v709_v52  ;;  %v707_v58 = vpack.c.bf16 %v704_v57, %v703_v54 }
 0x12c   : > { %v732_v60 = vsel %vm731_vm7, %v1759_v51, %v1764_v56  ;;  %v733_v61 = vsel %vm731_vm7, %v1760_v50, %v1765_v55  ;;  %874 = vmatprep.subr.bf16.mxu1 %v1921_v2 }
 0x12d   : > { %v1768_v59 = vpop.permute.xlu0 %1767  ;;  %830 = vmatpush1.bf16.msra.mxu0 %v707_v58  ;;  %v1773_v62 = vpop.permute.xlu1 %1772  ;;  %v739_v1 = vpack.c.bf16 %v733_v61, %v732_v60 }
 0x12e   : > { %v1770_v63 = vunpack.i.h.bf16 %v1768_v59  ;;  %v1769_v0 = vunpack.i.l.bf16 %v1768_v59  ;;  %v1775_v10 = vunpack.i.h.bf16 %v1773_v62  ;;  %v1774_v11 = vunpack.i.l.bf16 %v1773_v62 }
 0x12f   : > { %831 = vmatprep.subr.bf16.mxu0 %v739_v1 }
 0x130   : > { %v734_v3 = vsel %vm731_vm7, %v1769_v0, %v1759_v51  ;;  %v735_v4 = vsel %vm731_vm7, %v1770_v63, %v1760_v50  ;;  %v736_v5 = vsel %vm731_vm7, %v1764_v56, %v1769_v0  ;;  %v737_v6 = vsel %vm731_vm7, %v1765_v55, %v1770_v63 }
 0x131   : > { %v1778_v7 = vpop.permute.xlu0 %1777  ;;  %v738_v8 = vpack.c.bf16 %v735_v4, %v734_v3  ;;  %v740_v9 = vpack.c.bf16 %v737_v6, %v736_v5  ;;  %v1783_v12 = vpop.permute.xlu1 %1782 }
 0x132   : > { %v1780_v13 = vunpack.i.h.bf16 %v1778_v7  ;;  %v1779_v14 = vunpack.i.l.bf16 %v1778_v7  ;;  %v1785_v15 = vunpack.i.h.bf16 %v1783_v12  ;;  %v1784_v16 = vunpack.i.l.bf16 %v1783_v12 }
 0x133   : > { %832 = vmatpush1.bf16.msra.mxu0 %v738_v8  ;;  %875 = vmatpush1.bf16.msra.mxu1 %v740_v9 }
 0x134   : > { %876 = vmatprep.subr.bf16.mxu1 %v1921_v2  ;;  %v763_v17 = vsel %vm762_vm8, %v1774_v11, %v1779_v14  ;;  %v764_v18 = vsel %vm762_vm8, %v1775_v10, %v1780_v13  ;;  %v767_v20 = vsel %vm762_vm8, %v1779_v14, %v1784_v16  ;;  %v768_v21 = vsel %vm762_vm8, %v1780_v13, %v1785_v15  ;;  %v1909_v13 = vld [vmem:[%s2478_s7 + $0x4] ss:$8 sps:$4 sm:$0xff]  }
 0x135   : > { %v770_v19 = vpack.c.bf16 %v764_v18, %v763_v17  ;;  %v765_v22 = vsel %vm762_vm8, %v1784_v16, %v1774_v11  ;;  %v771_v23 = vpack.c.bf16 %v768_v21, %v767_v20  ;;  %v766_v25 = vsel %vm762_vm8, %v1785_v15, %v1775_v10  ;;  %v1344_v14 = vld [vmem:[%s2479_s8] sm:$0xff]  ;;  %v1345_v15 = vld [vmem:[%s2479_s8 + $0x8] sm:$0xff] }
 0x136   : > { %v769_v26 = vpack.c.bf16 %v766_v25, %v765_v22  ;;  %v1362_v16 = vld [vmem:[%s2480_s9] sm:$0xff]  ;;  %v1363_v17 = vld [vmem:[%s2480_s9 + $0x8] sm:$0xff] }
 0x137   : > { %833 = vmatprep.subr.bf16.mxu0 %v770_v19  ;;  %877 = vmatpush1.bf16.msra.mxu1 %v771_v23  ;;  %v1501_v18 = vld [vmem:[%s2482_s11] sm:$0xff]  ;;  %v1502_v19 = vld [vmem:[%s2482_s11 + $0x8] sm:$0xff] }
 0x138   : > { %834 = vmatpush1.bf16.msra.mxu0 %v769_v26  ;;  %1303 = vmatprep.subr.bf16.mxu1 %v1921_v2  ;;  %v1519_v20 = vld [vmem:[%s2483_s12] sm:$0xff]  ;;  %v1520_v21 = vld [vmem:[%s2483_s12 + $0x8] sm:$0xff] }
 0x13a   : > { %893 = vmatmul.mubr.bf16.vlgmr.msra.gmra.mrb[0].mxu1 %v1906_v28 }
 0x13b   : > { %850 = vmatmul.mubr.bf16.vlgmr.msra.gmra.mrb[0].mxu0 %v1906_v28  ;;  %1630 = vmatprep.mubr.msk.bf16.mxu1 %vm813_vm0, %v1909_v13 }
 0x13c   : > { %1629 = vmatprep.mubr.msk.bf16.mxu0 %vm813_vm0, %v1909_v13 }
 0x142   : > { %v906_v29 = vpop.permute.xlu0 %905  ;;  %v911_v30 = vpop.permute.xlu1 %910 }
 0x146   : > { %v924_v31 = vpop.permute.xlu0 %923  ;;  %v929_v47 = vpop.permute.xlu1 %928 }
 0x20d   : > { %v894_v38 = vpop.f32.mrb[0].mxu1 }
 0x20e   : > { %v915_v39 = vmul.f32 %v906_v29, %v894_v38  ;;  %v851_v40 = vpop.f32.mrb[0].mxu0  ;;  %v896_v43 = vpop.f32.mrb[1].mxu1 }
 0x20f   : > { %v913_v45 = vmul.f32 %v906_v29, %v851_v40  ;;  %v853_v46 = vpop.f32.mrb[1].mxu0  ;;  %v897_v32 = vpop.f32.mrb[2].mxu1 }
 0x210   : > { %v933_v33 = vadd.f32 %v924_v31, %v915_v39  ;;  %v914_v34 = vmul.f32 %v906_v29, %v853_v46  ;;  %v918_v41 = vmul.f32 %v911_v30, %v897_v32  ;;  %v855_v36 = vpop.f32.mrb[2].mxu0  ;;  %v899_v37 = vpop.f32.mrb[3].mxu1 }
 0x211   : > { %v931_v42 = vadd.f32 %v924_v31, %v913_v45  ;;  %v916_v44 = vmul.f32 %v911_v30, %v855_v36  ;;  %v857_v48 = vpop.f32.mrb[3].mxu0 }
 0x212   : > { %vm939_vm9 = vcmp.ge.f32.partialorder %v933_v33, 0.0  ;;  %v945_v49 = vmul.f32 0.2, %v933_v33  ;;  %v932_v50 = vadd.f32 %v924_v31, %v914_v34  ;;  %v936_v51 = vadd.f32 %v929_v47, %v918_v41 }
 0x213   : > { %vm937_vm10 = vcmp.ge.f32.partialorder %v931_v42, 0.0  ;;  %v943_v52 = vmul.f32 0.2, %v931_v42  ;;  %v934_v54 = vadd.f32 %v929_v47, %v916_v44  ;;  %v917_v55 = vmul.f32 %v911_v30, %v857_v48 }
 0x214   : > { %v951_v56 = vsel %vm939_vm9, %v933_v33, %v945_v49  ;;  %vm938_vm11 = vcmp.ge.f32.partialorder %v932_v50, 0.0  ;;  %v944_v57 = vmul.f32 0.2, %v932_v50  ;;  %vm942_vm12 = vcmp.ge.f32.partialorder %v936_v51, 0.0 }
 0x215   : > { %v948_v58 = vmul.f32 0.2, %v936_v51  ;;  %vm940_vm13 = vcmp.ge.f32.partialorder %v934_v54, 0.0  ;;  %v949_v59 = vsel %vm937_vm10, %v931_v42, %v943_v52  ;;  %v946_v61 = vmul.f32 0.2, %v934_v54 }
 0x216   : > { %v950_v60 = vsel %vm938_vm11, %v932_v50, %v944_v57  ;;  %v935_v62 = vadd.f32 %v929_v47, %v917_v55  ;;  %v2243_v63 = vmul.f32 %v951_v56, %v2041_v35  ;;  %v2249_v5 = vmul.f32 %v949_v59, %v2037_v24 }
 0x217   : > { %v954_v0 = vsel %vm942_vm12, %v936_v51, %v948_v58  ;;  %v952_v3 = vsel %vm940_vm13, %v934_v54, %v946_v61  ;;  %v2252_v6 = vmul.f32 %v950_v60, %v2039_v27 }
 0x218   : > { %v2246_v1 = vmul.f32 %v954_v0, %v2041_v35  ;;  %vm941_vm14 = vcmp.ge.f32.partialorder %v935_v62, 0.0  ;;  %v947_v4 = vmul.f32 0.2, %v935_v62  ;;  %v2255_v7 = vmul.f32 %v952_v3, %v2037_v24 }
 0x21a   : > { %v953_v8 = vsel %vm941_vm14, %v935_v62, %v947_v4  ;;  %v1791_v9 = vpack.i.bf16 %v2246_v1, %v2243_v63  ;;  %v1806_v35 = vpack.i.bf16 %v2255_v7, %v2249_v5  ;;  %v1093_v12 = vpack.c.bf16 %v2255_v7, %v2249_v5 }
 0x21b   : > { %v2260_v10 = vmul.f32 %v953_v8, %v2039_v27  ;;  %v1095_v27 = vpack.c.bf16 %v2246_v1, %v2243_v63 }
 0x21c   : > { %1792 = vrot.lane.b32.xlu1 %v1791_v9, %s1923_s27  ;;  %1787 = vrot.lane.b32.xlu0 %v1791_v9, %s1922_s24 }
 0x21d   : > { %v1816_v11 = vpack.i.bf16 %v2260_v10, %v2252_v6  ;;  %v1094_v24 = vpack.c.bf16 %v2260_v10, %v2252_v6 }
 0x220   : > { %1797 = vrot.lane.b32.xlu0 %v1791_v9, %s1924_s28  ;;  %1807 = vrot.lane.b32.xlu1 %v1806_v35, %s1923_s27 }
 0x224   : > { %1802 = vrot.lane.b32.xlu0 %v1806_v35, %s1922_s24  ;;  %1817 = vrot.lane.b32.xlu1 %v1816_v11, %s1922_s24  ;;  %s2488_s24 = smov 110  }
 0x228   : > { %1812 = vrot.lane.b32.xlu0 %v1806_v35, %s1924_s28  ;;  %1822 = vrot.lane.b32.xlu1 %v1806_v35, %s1925_s29 }
 0x22c   : > { %1827 = vrot.lane.b32.xlu0 %v1816_v11, %s1923_s27  ;;  %1832 = vrot.lane.b32.xlu1 %v1816_v11, %s1924_s28 }
 0x230   : > { %1847 = vrot.lane.b32.xlu0 %v1806_v35, %s1926_s30  ;;  %1837 = vrot.lane.b32.xlu1 %v1791_v9, %s1925_s29 }
 0x234   : > { %1852 = vrot.lane.b32.xlu0 %v1816_v11, %s1925_s29  ;;  %1842 = vrot.lane.b32.xlu1 %v1791_v9, %s1926_s30 }
 0x238   : > { %1857 = vrot.lane.b32.xlu0 %v1791_v9, %s1927_s14  ;;  %1862 = vrot.lane.b32.xlu1 %v1806_v35, %s1927_s14 }
 0x23c   : > { %1867 = vrot.lane.b32.xlu0 %v1816_v11, %s1926_s30  ;;  %1872 = vrot.lane.b32.xlu1 %v1816_v11, %s1927_s14 }
 0x240   : > { %1882 = vrot.lane.b32.xlu0 %v1806_v35, %s2488_s24  ;;  %1877 = vrot.lane.b32.xlu1 %v1791_v9, %s2488_s24 }
 0x244   : > { %1887 = vrot.lane.b32.xlu0 %v1816_v11, %s2488_s24  ;;  %1897 = vrot.lane.b32.xlu1 %v1816_v11, %s1929_s19 }
 0x248   : > { %1892 = vrot.lane.b32.xlu0 %v1791_v9, %s1929_s19  ;;  %1902 = vrot.lane.b32.xlu1 %v1806_v35, %s1929_s19  ;;  %s2460_s19 = scalar_lea.vmem %s2484_s13, %s2489_s22 }
 0x24c   : > { %1348 = vperm.xlu0 %1664, %v1344_v14   ;;  %1353 = vperm.xlu1 %1665, %v1345_v15  }
 0x250   : > { %1366 = vperm.xlu0 %1664, %v1362_v16   ;;  %1371 = vperm.xlu1 %1665, %v1363_v17  }
 0x254   : > { %1505 = vperm.xlu0 %1664, %v1501_v18   ;;  %1510 = vperm.xlu1 %1665, %v1502_v19  }
 0x258   : > { %1523 = vperm.xlu0 %1664, %v1519_v20   ;;  %1528 = vperm.xlu1 %1665, %v1520_v21  }
 0x28e   : > { %v1793_v22 = vpop.permute.xlu1 %1792  ;;  %v1788_v23 = vpop.permute.xlu0 %1787 }
 0x28f   : > { %v1790_v28 = vunpack.i.h.bf16 %v1788_v23  ;;  %v1789_v29 = vunpack.i.l.bf16 %v1788_v23  ;;  %v1795_v49 = vunpack.i.h.bf16 %v1793_v22  ;;  %v1794_v50 = vunpack.i.l.bf16 %v1793_v22 }
 0x292   : > { %v1798_v25 = vpop.permute.xlu0 %1797  ;;  %v1808_v26 = vpop.permute.xlu1 %1807 }
 0x293   : > { %v1810_v44 = vunpack.i.h.bf16 %v1808_v26  ;;  %v1809_v51 = vunpack.i.l.bf16 %v1808_v26  ;;  %v1800_v59 = vunpack.i.h.bf16 %v1798_v25  ;;  %v1799_v60 = vunpack.i.l.bf16 %v1798_v25 }
 0x295   : > { %v1020_v61 = vsel %vm564_vm2, %v1795_v49, %v1810_v44  ;;  %v1019_v8 = vsel %vm564_vm2, %v1794_v50, %v1809_v51 }
 0x296   : > { %v1803_v30 = vpop.permute.xlu0 %1802  ;;  %v1818_v31 = vpop.permute.xlu1 %1817  ;;  %v1021_v21 = vpack.c.bf16 %v1020_v61, %v1019_v8 }
 0x297   : > { %v1805_v38 = vunpack.i.h.bf16 %v1803_v30  ;;  %v1804_v39 = vunpack.i.l.bf16 %v1803_v30  ;;  %v1820_v40 = vunpack.i.h.bf16 %v1818_v31  ;;  %v1819_v43 = vunpack.i.l.bf16 %v1818_v31 }
 0x299   : > { %v990_v45 = vsel %vm533_vm1, %v1790_v28, %v1805_v38  ;;  %v989_v46 = vsel %vm533_vm1, %v1789_v29, %v1804_v39  ;;  %v986_v32 = vsel %vm533_vm1, %v1820_v40, %v1790_v28  ;;  %v985_v33 = vsel %vm533_vm1, %v1819_v43, %v1789_v29 }
 0x29a   : > { %v993_v34 = vpack.c.bf16 %v986_v32, %v985_v33  ;;  %v1813_v41 = vpop.permute.xlu0 %1812  ;;  %v2333_v36 = vpop.permute.xlu1 %1822  ;;  %v987_v37 = vsel %vm533_vm1, %v1804_v39, %v1819_v43  ;;  %v988_v47 = vsel %vm533_vm1, %v1805_v38, %v1820_v40  ;;  %v991_v42 = vpack.c.bf16 %v990_v45, %v989_v46 }
 0x29b   : > { %v992_v48 = vpack.c.bf16 %v988_v47, %v987_v37  ;;  %v1815_v62 = vunpack.i.h.bf16 %v1813_v41  ;;  %v1814_v0 = vunpack.i.l.bf16 %v1813_v41  ;;  %v1824_v26 = vunpack.i.l.bf16 %v2333_v36 }
 0x29c   : > { %1304 = vmatpush1.bf16.msra.mxu1 %v993_v34  ;;  %v1825_v38 = vunpack.i.h.bf16 %v2333_v36 }
 0x29d   : > { %1305 = vmatprep.subr.bf16.mxu1 %v1921_v2  ;;  %1260 = vmatprep.subr.bf16.mxu0 %v992_v48  ;;  %v1050_v22 = vsel %vm595_vm3, %v1800_v59, %v1815_v62  ;;  %v1049_v23 = vsel %vm595_vm3, %v1799_v60, %v1814_v0 }
 0x29e   : > { %v1828_v52 = vpop.permute.xlu0 %1827  ;;  %v1833_v54 = vpop.permute.xlu1 %1832  ;;  %1261 = vmatpush1.bf16.msra.mxu0 %v991_v42  ;;  %v1051_v43 = vpack.c.bf16 %v1050_v22, %v1049_v23 }
 0x29f   : > { %v1830_v55 = vunpack.i.h.bf16 %v1828_v52  ;;  %v1829_v56 = vunpack.i.l.bf16 %v1828_v52  ;;  %v1835_v57 = vunpack.i.h.bf16 %v1833_v54  ;;  %v1834_v58 = vunpack.i.l.bf16 %v1833_v54 }
 0x2a1   : > { %v1016_v3 = vsel %vm564_vm2, %v1830_v55, %v1795_v49  ;;  %v1015_v4 = vsel %vm564_vm2, %v1829_v56, %v1794_v50  ;;  %v1017_v13 = vsel %vm564_vm2, %v1809_v51, %v1829_v56  ;;  %v1018_v14 = vsel %vm564_vm2, %v1810_v44, %v1830_v55 }
 0x2a2   : > { %v1023_v9 = vpack.c.bf16 %v1016_v3, %v1015_v4  ;;  %v2348_v35 = vpop.permute.xlu0 %1847  ;;  %v1838_v11 = vpop.permute.xlu1 %1837  ;;  %v1046_v15 = vsel %vm595_vm3, %v1835_v57, %v1800_v59  ;;  %v1045_v16 = vsel %vm595_vm3, %v1834_v58, %v1799_v60  ;;  %v1022_v18 = vpack.c.bf16 %v1018_v14, %v1017_v13 }
 0x2a3   : > { %v1839_v17 = vunpack.i.l.bf16 %v1838_v11  ;;  %v1047_v19 = vsel %vm595_vm3, %v1814_v0, %v1834_v58  ;;  %v1048_v20 = vsel %vm595_vm3, %v1815_v62, %v1835_v57  ;;  %v1840_v25 = vunpack.i.h.bf16 %v1838_v11 }
 0x2a4   : > { %1306 = vmatpush1.bf16.msra.mxu1 %v1023_v9  ;;  %v1053_v28 = vpack.c.bf16 %v1046_v15, %v1045_v16  ;;  %1262 = vmatprep.subr.bf16.mxu0 %v1022_v18  ;;  %v1052_v31 = vpack.c.bf16 %v1048_v20, %v1047_v19  ;;  %v1850_v48 = vunpack.i.h.bf16 %v2348_v35  ;;  %v1849_v49 = vunpack.i.l.bf16 %v2348_v35 }
 0x2a5   : > { %1307 = vmatprep.subr.bf16.mxu1 %v1921_v2  ;;  %1263 = vmatpush1.bf16.msra.mxu0 %v1021_v21  ;;  %v1079_v45 = vsel %vm626_vm4, %v1839_v17, %v1824_v26  ;;  %v1080_v46 = vsel %vm626_vm4, %v1840_v25, %v1825_v38 }
 0x2a6   : > { %v1853_v29 = vpop.permute.xlu0 %1852  ;;  %v1843_v30 = vpop.permute.xlu1 %1842  ;;  %1264 = vmatprep.subr.bf16.mxu0 %v1052_v31  ;;  %v1081_v51 = vpack.c.bf16 %v1080_v46, %v1079_v45 }
 0x2a7   : > { %v1855_v39 = vunpack.i.h.bf16 %v1853_v29  ;;  %v1854_v40 = vunpack.i.l.bf16 %v1853_v29  ;;  %v1845_v34 = vunpack.i.h.bf16 %v1843_v30  ;;  %v1844_v36 = vunpack.i.l.bf16 %v1843_v30 }
 0x2a8   : > { %1308 = vmatpush1.bf16.msra.mxu1 %v1053_v28 }
 0x2a9   : > { %v1075_v32 = vsel %vm626_vm4, %v1854_v40, %v1839_v17  ;;  %v1076_v33 = vsel %vm626_vm4, %v1855_v39, %v1840_v25  ;;  %1309 = vmatprep.subr.bf16.mxu1 %v1921_v2  ;;  %v1077_v42 = vsel %vm626_vm4, %v1824_v26, %v1854_v40  ;;  %v1078_v44 = vsel %vm626_vm4, %v1825_v38, %v1855_v39 }
 0x2aa   : > { %v1083_v41 = vpack.c.bf16 %v1076_v33, %v1075_v32  ;;  %v1858_v37 = vpop.permute.xlu0 %1857  ;;  %v1863_v47 = vpop.permute.xlu1 %1862  ;;  %1265 = vmatpush1.bf16.msra.mxu0 %v1051_v43  ;;  %v1082_v50 = vpack.c.bf16 %v1078_v44, %v1077_v42  ;;  %v1122_v55 = vsel %vm669_vm5, %v1845_v34, %v1850_v48  ;;  %v1121_v56 = vsel %vm669_vm5, %v1844_v36, %v1849_v49 }
 0x2ab   : > { %v1860_v52 = vunpack.i.h.bf16 %v1858_v37  ;;  %v1865_v54 = vunpack.i.h.bf16 %v1863_v47  ;;  %v1859_v57 = vunpack.i.l.bf16 %v1858_v37  ;;  %v1864_v58 = vunpack.i.l.bf16 %v1863_v47 }
 0x2ac   : > { %1310 = vmatpush1.bf16.msra.mxu1 %v1083_v41  ;;  %1266 = vmatprep.subr.bf16.mxu0 %v1082_v50  ;;  %v1125_v4 = vpack.c.bf16 %v1122_v55, %v1121_v56  ;;  %v1911_v55 = vld [vmem:[%s2478_s7] ss:$8 sps:$4 sm:$0xff]   ;;  %v1930_v56 = vmov 0.0  }
 0x2ad   : > { %1311 = vmatprep.subr.bf16.mxu1 %v1921_v2  ;;  %v1152_v8 = vsel %vm700_vm6, %v1860_v52, %v1865_v54  ;;  %v1151_v6 = vsel %vm700_vm6, %v1859_v57, %v1864_v58 }
 0x2ae   : > { %v1868_v59 = vpop.permute.xlu0 %1867  ;;  %v1873_v60 = vpop.permute.xlu1 %1872  ;;  %1267 = vmatpush1.bf16.msra.mxu0 %v1081_v51 }
 0x2af   : > { %v1870_v61 = vunpack.i.h.bf16 %v1868_v59  ;;  %v1869_v62 = vunpack.i.l.bf16 %v1868_v59  ;;  %v1875_v0 = vunpack.i.h.bf16 %v1873_v60  ;;  %v1874_v3 = vunpack.i.l.bf16 %v1873_v60  ;;  %1268 = vmatprep.subr.bf16.mxu0 %v1094_v24 }
 0x2b0   : > { %1312 = vmatpush1.bf16.msra.mxu1 %v1095_v27 }
 0x2b1   : > { %v1119_v9 = vsel %vm669_vm5, %v1849_v49, %v1869_v62  ;;  %v1120_v35 = vsel %vm669_vm5, %v1850_v48, %v1870_v61  ;;  %1313 = vmatprep.subr.bf16.mxu1 %v1921_v2  ;;  %v1117_v63 = vsel %vm669_vm5, %v1869_v62, %v1844_v36  ;;  %v1118_v1 = vsel %vm669_vm5, %v1870_v61, %v1845_v34 }
 0x2b2   : > { %v1123_v10 = vpack.c.bf16 %v1120_v35, %v1119_v9  ;;  %v1883_v24 = vpop.permute.xlu0 %1882  ;;  %v1878_v11 = vpop.permute.xlu1 %1877  ;;  %1269 = vmatpush1.bf16.msra.mxu0 %v1093_v12  ;;  %v1124_v16 = vpack.c.bf16 %v1118_v1, %v1117_v63  ;;  %v1147_v17 = vsel %vm700_vm6, %v1874_v3, %v1859_v57  ;;  %v1148_v18 = vsel %vm700_vm6, %v1875_v0, %v1860_v52 }
 0x2b3   : > { %v1885_v27 = vunpack.i.h.bf16 %v1883_v24  ;;  %v1884_v13 = vunpack.i.l.bf16 %v1883_v24  ;;  %v1880_v14 = vunpack.i.h.bf16 %v1878_v11  ;;  %v1879_v15 = vunpack.i.l.bf16 %v1878_v11 }
 0x2b4   : > { %1314 = vmatpush1.bf16.msra.mxu1 %v1125_v4  ;;  %v1149_v19 = vsel %vm700_vm6, %v1864_v58, %v1874_v3  ;;  %v1150_v20 = vsel %vm700_vm6, %v1865_v54, %v1875_v0  ;;  %v1155_v12 = vpack.c.bf16 %v1152_v8, %v1151_v6  ;;  %1270 = vmatprep.subr.bf16.mxu0 %v1124_v16 }
 0x2b5   : > { %v1182_v5 = vsel %vm731_vm7, %v1880_v14, %v1885_v27  ;;  %v1181_v7 = vsel %vm731_vm7, %v1879_v15, %v1884_v13  ;;  %1315 = vmatprep.subr.bf16.mxu1 %v1921_v2  ;;  %v1154_v23 = vpack.c.bf16 %v1148_v18, %v1147_v17  ;;  %v1153_v28 = vpack.c.bf16 %v1150_v20, %v1149_v19 }
 0x2b6   : > { %v1888_v21 = vpop.permute.xlu0 %1887  ;;  %v1898_v22 = vpop.permute.xlu1 %1897  ;;  %1271 = vmatpush1.bf16.msra.mxu0 %v1123_v10  ;;  %v1185_v29 = vpack.c.bf16 %v1182_v5, %v1181_v7 }
 0x2b7   : > { %v1890_v25 = vunpack.i.h.bf16 %v1888_v21  ;;  %v1889_v26 = vunpack.i.l.bf16 %v1888_v21  ;;  %1272 = vmatprep.subr.bf16.mxu0 %v1154_v23  ;;  %v1900_v43 = vunpack.i.h.bf16 %v1898_v22  ;;  %v1899_v45 = vunpack.i.l.bf16 %v1898_v22 }
 0x2b8   : > { %1316 = vmatpush1.bf16.msra.mxu1 %v1155_v12 }
 0x2b9   : > { %v1179_v30 = vsel %vm731_vm7, %v1884_v13, %v1889_v26  ;;  %v1180_v31 = vsel %vm731_vm7, %v1885_v27, %v1890_v25  ;;  %1317 = vmatprep.subr.bf16.mxu1 %v1921_v2  ;;  %v1177_v38 = vsel %vm731_vm7, %v1889_v26, %v1879_v15  ;;  %v1178_v39 = vsel %vm731_vm7, %v1890_v25, %v1880_v14  ;;  %v1912_v25 = vld [vmem:[%s2481_s10] sm:$0xff]  }
 0x2ba   : > { %v1183_v40 = vpack.c.bf16 %v1180_v31, %v1179_v30  ;;  %v1893_v46 = vpop.permute.xlu0 %1892  ;;  %v1903_v32 = vpop.permute.xlu1 %1902  ;;  %v1184_v33 = vpack.c.bf16 %v1178_v39, %v1177_v38  ;;  %1273 = vmatpush1.bf16.msra.mxu0 %v1153_v28 }
 0x2bb   : > { %v1895_v34 = vunpack.i.h.bf16 %v1893_v46  ;;  %v1894_v41 = vunpack.i.l.bf16 %v1893_v46  ;;  %v1905_v36 = vunpack.i.h.bf16 %v1903_v32  ;;  %v1904_v37 = vunpack.i.l.bf16 %v1903_v32 }
 0x2bc   : > { %1274 = vmatprep.subr.bf16.mxu0 %v1184_v33  ;;  %1318 = vmatpush1.bf16.msra.mxu1 %v1185_v29 }
 0x2bd   : > { %v1212_v47 = vsel %vm762_vm8, %v1895_v34, %v1905_v36  ;;  %v1209_v42 = vsel %vm762_vm8, %v1904_v37, %v1899_v45  ;;  %v1210_v44 = vsel %vm762_vm8, %v1905_v36, %v1900_v43  ;;  %v1211_v48 = vsel %vm762_vm8, %v1894_v41, %v1904_v37  ;;  %1319 = vmatprep.subr.bf16.mxu1 %v1921_v2 }
 0x2be   : > { %v1215_v49 = vpack.c.bf16 %v1212_v47, %v1211_v48  ;;  %v1207_v50 = vsel %vm762_vm8, %v1899_v45, %v1894_v41  ;;  %v1208_v51 = vsel %vm762_vm8, %v1900_v43, %v1895_v34  ;;  %v1213_v52 = vpack.c.bf16 %v1210_v44, %v1209_v42  ;;  %1275 = vmatpush1.bf16.msra.mxu0 %v1183_v40 }
 0x2bf   : > { %v1214_v54 = vpack.c.bf16 %v1208_v51, %v1207_v50 }
 0x2c0   : > { %1320 = vmatpush1.bf16.msra.mxu1 %v1215_v49 }
 0x2c1   : > { %1276 = vmatprep.subr.bf16.mxu0 %v1214_v54  ;;  %1638 = vmatprep.subr.bf16.mxu1 %v1930_v56 }
 0x2c2   : > { %1277 = vmatpush1.bf16.msra.mxu0 %v1213_v52 }
 0x2c3   : > { %1336 = vmatmul.mubr.bf16.vlgmr.msra.gmra.mrb[4].mxu1 %v1911_v55 }
 0x2c4   : > { %1640 = vmatprep.mubr.msk.bf16.mxu1 %vm1931_vm15, %v1930_v56 }
 0x2c5   : > { %1293 = vmatmul.mubr.bf16.vlgmr.msra.gmra.mrb[4].mxu0 %v1911_v55 }
 0x2c6   : > { %1449 = vmatprep.mubr.bf16.mxu0 %v1921_v2 }
 0x2cb   : > { %v1349_v53 = vpop.permute.xlu0 %1348  ;;  %v1354_v57 = vpop.permute.xlu1 %1353 }
 0x2cf   : > { %v1367_v61 = vpop.permute.xlu0 %1366  ;;  %v1372_v9 = vpop.permute.xlu1 %1371 }
 0x2d3   : > { %v1506_v31 = vpop.permute.xlu0 %1505  ;;  %v1511_v38 = vpop.permute.xlu1 %1510 }
 0x2d7   : > { %v1524_v45 = vpop.permute.xlu0 %1523  ;;  %v1529_v41 = vpop.permute.xlu1 %1528 }
 0x396   : > { %v1337_v58 = vpop.f32.mrb[4].mxu1 }
 0x397   : > { %v1358_v59 = vmul.f32 %v1349_v53, %v1337_v58  ;;  %v1339_v60 = vpop.f32.mrb[5].mxu1 }
 0x398   : > { %v1340_v62 = vpop.f32.mrb[6].mxu1  ;;  %v1294_v3 = vpop.f32.mrb[4].mxu0 }
 0x399   : > { %v1376_v0 = vadd.f32 %v1367_v61, %v1358_v59  ;;  %v1361_v4 = vmul.f32 %v1354_v57, %v1340_v62  ;;  %v1342_v8 = vpop.f32.mrb[7].mxu1  ;;  %v1356_v35 = vmul.f32 %v1349_v53, %v1294_v3  ;;  %v1296_v6 = vpop.f32.mrb[5].mxu0 }
 0x39a   : > { %v1357_v2 = vmul.f32 %v1349_v53, %v1296_v6  ;;  %v1298_v11 = vpop.f32.mrb[6].mxu0 }
 0x39b   : > { %v1388_v10 = vmul.f32 0.2, %v1376_v0  ;;  %v1379_v24 = vadd.f32 %v1372_v9, %v1361_v4  ;;  %vm1382_vm1 = vcmp.ge.f32.partialorder %v1376_v0, 0.0  ;;  %v1374_v63 = vadd.f32 %v1367_v61, %v1356_v35  ;;  %v1300_v27 = vpop.f32.mrb[7].mxu0 }
 0x39c   : > { %v1359_v1 = vmul.f32 %v1354_v57, %v1298_v11  ;;  %v1375_v13 = vadd.f32 %v1367_v61, %v1357_v2  ;;  %v1360_v17 = vmul.f32 %v1354_v57, %v1300_v27 }
 0x39d   : > { %vm1385_vm2 = vcmp.ge.f32.partialorder %v1379_v24, 0.0  ;;  %v1391_v14 = vmul.f32 0.2, %v1379_v24  ;;  %v1386_v15 = vmul.f32 0.2, %v1374_v63  ;;  %v1394_v18 = vsel %vm1382_vm1, %v1376_v0, %v1388_v10 }
 0x39e   : > { %v1377_v16 = vadd.f32 %v1372_v9, %v1359_v1  ;;  %vm1380_vm3 = vcmp.ge.f32.partialorder %v1374_v63, 0.0  ;;  %v1387_v20 = vmul.f32 0.2, %v1375_v13  ;;  %v1378_v7 = vadd.f32 %v1372_v9, %v1360_v17 }
 0x39f   : > { %v1397_v19 = vsel %vm1385_vm2, %v1379_v24, %v1391_v14  ;;  %vm1381_vm5 = vcmp.ge.f32.partialorder %v1375_v13, 0.0  ;;  %v1392_v21 = vsel %vm1380_vm3, %v1374_v63, %v1386_v15 }
 0x3a0   : > { %vm1383_vm4 = vcmp.ge.f32.partialorder %v1377_v16, 0.0  ;;  %v1389_v5 = vmul.f32 0.2, %v1377_v16  ;;  %v1400_v12 = vpack.c.bf16 %v1397_v19, %v1394_v18  ;;  %vm1384_vm6 = vcmp.ge.f32.partialorder %v1378_v7, 0.0 }
 0x3a1   : > { %v1390_v23 = vmul.f32 0.2, %v1378_v7  ;;  %v1393_v28 = vsel %vm1381_vm5, %v1375_v13, %v1387_v20 }
 0x3a2   : > { %v1395_v22 = vsel %vm1383_vm4, %v1377_v16, %v1389_v5  ;;  %1639 = vmatpush3.bf16.msra.mxu1 %v1400_v12 }
 0x3a3   : > { %v1398_v26 = vpack.c.bf16 %v1395_v22, %v1392_v21  ;;  %v1396_v29 = vsel %vm1384_vm6, %v1378_v7, %v1390_v23 }
 0x3a4   : > { %v1399_v30 = vpack.c.bf16 %v1396_v29, %v1393_v28 }
 0x3a5   : > { %1641 = vmatmul.mubr.msk.bf16.vlgmr.msra.gmra.mrb[8].mxu1 %vm813_vm0, %v1912_v25 }
 0x3a6   : > { %1417 = vmatprep.subr.bf16.mxu0 %v1399_v30 }
 0x3a7   : > { %1418 = vmatpush1.bf16.msra.mxu0 %v1398_v26 }
 0x3aa   : > { %1632 = vmatmul.mubr.msk.bf16.vlgmr.msra.gmra.mrb[8].mxu0 %vm813_vm0, %v1912_v25 }
 0x478   : > { %v1494_v39 = vpop.f32.mrb[8].mxu1 }
 0x479   : > { %v1515_v40 = vmul.f32 %v1506_v31, %v1494_v39  ;;  %v1642_v43 = vpop.f32.mrb[9].mxu1 }
 0x47a   : > { %v1497_v46 = vpop.f32.mrb[10].mxu1 }
 0x47b   : > { %v1533_v32 = vadd.f32 %v1524_v45, %v1515_v40  ;;  %v1518_v33 = vmul.f32 %v1511_v38, %v1497_v46  ;;  %v1643_v34 = vpop.f32.mrb[11].mxu1 }
 0x47d   : > { %vm1539_vm7 = vcmp.ge.f32.partialorder %v1533_v32, 0.0  ;;  %v1545_v36 = vmul.f32 0.2, %v1533_v32  ;;  %v1536_v37 = vadd.f32 %v1529_v41, %v1518_v33  ;;  %v1451_v47 = vpop.f32.mrb[8].mxu0 }
 0x47e   : > { %v1513_v42 = vmul.f32 %v1506_v31, %v1451_v47  ;;  %v1453_v44 = vpop.f32.mrb[9].mxu0 }
 0x47f   : > { %v1551_v48 = vsel %vm1539_vm7, %v1533_v32, %v1545_v36  ;;  %vm1542_vm0 = vcmp.ge.f32.partialorder %v1536_v37, 0.0  ;;  %v1548_v49 = vmul.f32 0.2, %v1536_v37  ;;  %v1514_v50 = vmul.f32 %v1506_v31, %v1453_v44  ;;  %v1455_v51 = vpop.f32.mrb[10].mxu0 }
 0x480   : > { %1557 = vst [vmem:[%s2460_s19 + $0x10] sm:$0xff] %v1551_v48  ;;  %v1531_v52 = vadd.f32 %v1524_v45, %v1513_v42  ;;  %v1516_v54 = vmul.f32 %v1511_v38, %v1455_v51  ;;  %v1457_v55 = vpop.f32.mrb[11].mxu0 }
 0x481   : > { %v1554_v56 = vsel %vm1542_vm0, %v1536_v37, %v1548_v49  ;;  %v1532_v53 = vadd.f32 %v1524_v45, %v1514_v50  ;;  %v1517_v57 = vmul.f32 %v1511_v38, %v1457_v55 }
 0x482   : > { %1560 = vst [vmem:[%s2460_s19 + $0x28] sm:$0xff] %v1554_v56  ;;  %vm1537_vm8 = vcmp.ge.f32.partialorder %v1531_v52, 0.0  ;;  %v1543_v58 = vmul.f32 0.2, %v1531_v52  ;;  %v1534_v59 = vadd.f32 %v1529_v41, %v1516_v54 }
 0x483   : > { %vm1538_vm9 = vcmp.ge.f32.partialorder %v1532_v53, 0.0  ;;  %v1544_v60 = vmul.f32 0.2, %v1532_v53  ;;  %v1535_v61 = vadd.f32 %v1529_v41, %v1517_v57 }
 0x484   : > { %v1549_v62 = vsel %vm1537_vm8, %v1531_v52, %v1543_v58  ;;  %vm1540_vm10 = vcmp.ge.f32.partialorder %v1534_v59, 0.0  ;;  %v1546_v0 = vmul.f32 0.2, %v1534_v59 }
 0x485   : > { %1555 = vst [vmem:[%s2460_s19] sm:$0xff] %v1549_v62  ;;  %v1550_v3 = vsel %vm1538_vm9, %v1532_v53, %v1544_v60  ;;  %vm1541_vm11 = vcmp.ge.f32.partialorder %v1535_v61, 0.0  ;;  %v1547_v4 = vmul.f32 0.2, %v1535_v61 }
 0x486   : > { %1556 = vst [vmem:[%s2460_s19 + $0x8] sm:$0xff] %v1550_v3  ;;  %v1552_v8 = vsel %vm1540_vm10, %v1534_v59, %v1546_v0 }
 0x487   : > { %1558 = vst [vmem:[%s2460_s19 + $0x18] sm:$0xff] %v1552_v8  ;;  %v1553_v9 = vsel %vm1541_vm11, %v1535_v61, %v1547_v4 }
 0x488   : > { %1559 = vst [vmem:[%s2460_s19 + $0x20] sm:$0xff] %v1553_v9 }
 0x489 PF: > { %s23_s25 = sadd.s32 1, %s1919_s25  }
 0x48a   : > { %p20_p4 = scmp.ge.s32.totalorder %s23_s25, 4  }
 0x48c   :  { %22 = sbr.rel (!%p20_p4) target bundleno = 1 (0x1), region = 102 }

</bundles_post_ra>
